<compile_context>
chip_gen: v6e
topology: v6e:2x2x1
jax: 0.10.0
libtpu: 0.0.40
codegen_flags: <defaults>
</compile_context>

<pallas_src>
import jax
import jax.numpy as jnp
from jax.experimental import pallas as pl
from jax.experimental.pallas import tpu as pltpu

HIDDEN = 512
NEG_SLOPE = 0.2


def _leaky_relu(x, neg_slope):
    return jnp.where(x > 0, x, neg_slope * x)


def discriminator_kernel(z_ref, w1_ref, b1_ref, w2_ref, b2_ref, w3_ref, b3_ref,
                         o_ref):
    """One batch tile of the fused 3-layer MLP.

    z_ref : [TM, z_dim]  f32     w1_ref: [z_dim, 512] bf16   b1_ref: [1, 512] f32
    w2_ref: [512, 512]   bf16    b2_ref: [1, 512]     f32
    w3_ref: [1, 512]     f32     b3_ref: [1, 1]       f32
    o_ref : [1, 1, TM]   f32     (lane-dense logits for this tile)
    """
    # Layer 1: in-kernel f32 -> bf16 cast (free VPU slot), MXU matmul, f32 acc.
    zb = z_ref[...].astype(jnp.bfloat16)
    h = jnp.dot(zb, w1_ref[...], preferred_element_type=jnp.float32) + b1_ref[...]
    h = _leaky_relu(h, NEG_SLOPE)

    # Layer 2
    h = jnp.dot(h.astype(jnp.bfloat16), w2_ref[...],
                preferred_element_type=jnp.float32) + b2_ref[...]
    h = _leaky_relu(h, NEG_SLOPE)

    # Layer 3 (true output width 1): VPU broadcast-mul + XLU lane reduce
    # instead of a 512x128 zero-padded MXU matmul.  Result written lane-dense.
    logits = jnp.sum(h * w3_ref[...], axis=-1, keepdims=True) + b3_ref[...]  # [TM, 1]
    o_ref[...] = logits.reshape(o_ref.shape).astype(o_ref.dtype)


def _pick_tile_m(B):
    """Batch tile: small tiles for small B (2 TensorCores on v7x stay busy),
    large tiles for big B (amortize ~0.35us/step grid overhead)."""
    if B <= 512:
        return 128
    if B <= 2048:
        return 256
    return 512


@jax.jit
def discriminator_forward(z, params):
    """z: [B, z_dim] float32  ->  preds (raw logits, no sigmoid): [B, 1] float32."""
    w1, b1, w2, b2, w3r, b3 = params
    B, z_dim = z.shape

    tm = _pick_tile_m(B)
    n_tiles = pl.cdiv(B, tm)
    Bp = n_tiles * tm

    z_in = z.astype(jnp.float32)
    if Bp != B:
        # Only materialize a padded copy for ragged batches; padded rows yield
        # garbage logits that are sliced off below (cheap: output is [Bp, 1]).
        z_in = jnp.zeros((Bp, z_dim), z_in.dtype).at[:B].set(z_in)

    const2 = lambda i: (0, 0)  # weights/biases resident across all grid steps

    out = pl.pallas_call(
        discriminator_kernel,
        out_shape=jax.ShapeDtypeStruct((n_tiles, 1, tm), jnp.float32),
        grid=(n_tiles,),
        in_specs=[
            pl.BlockSpec((tm, z_dim), lambda i: (i, 0)),   # z: tiled over batch
            pl.BlockSpec((z_dim, HIDDEN), const2),         # w1 (bf16)
            pl.BlockSpec((1, HIDDEN), const2),             # b1 (f32)
            pl.BlockSpec((HIDDEN, HIDDEN), const2),        # w2 (bf16)
            pl.BlockSpec((1, HIDDEN), const2),             # b2 (f32)
            pl.BlockSpec((1, HIDDEN), const2),             # w3 row (f32)
            pl.BlockSpec((1, 1), const2),                  # b3 (f32)
        ],
        out_specs=pl.BlockSpec((1, 1, tm), lambda i: (i, 0, 0)),  # lane-dense logits
        compiler_params=pltpu.CompilerParams(
            dimension_semantics=("parallel",),  # shard batch tiles across v7x's 2 TCs
        ),
    )(z_in, w1, b1, w2, b2, w3r, b3)

    preds = out.reshape(Bp, 1)
    if Bp != B:
        preds = preds[:B]
    return preds


def init_discriminator_params(key, z_dim):
    """PyTorch nn.Linear-style U(-1/sqrt(fan_in), 1/sqrt(fan_in)) init.

    w1/w2 stored [in, out] in bf16 (kernel computes x @ W with f32 acc);
    biases stay f32 as [1, out].  The final 512->1 layer is stored as a
    [1, 512] f32 row (w3r) plus a [1, 1] f32 bias so the kernel can do a lane
    reduce instead of a lane-padded matmul.
    """
    ks = jax.random.split(key, 6)

    def lin(kw, kb, fan_in, fan_out):
        bound = float(fan_in) ** -0.5
        w = jax.random.uniform(kw, (fan_in, fan_out), jnp.float32, -bound, bound)
        b = jax.random.uniform(kb, (1, fan_out), jnp.float32, -bound, bound)
        return w, b

    w1, b1 = lin(ks[0], ks[1], z_dim, HIDDEN)
    w2, b2 = lin(ks[2], ks[3], HIDDEN, HIDDEN)
    w3, b3 = lin(ks[4], ks[5], HIDDEN, 1)

    w3r = w3.T                    # [1, 512] f32
    b3r = b3.reshape(1, 1)        # [1, 1]   f32

    return (w1.astype(jnp.bfloat16), b1,
            w2.astype(jnp.bfloat16), b2,
            w3r, b3r)


def _reference_forward(z, params):
    """Plain-JAX reference with the same bf16 quantization points as the kernel."""
    w1, b1, w2, b2, w3r, b3 = params
    f32 = lambda a: a.astype(jnp.float32)
    zq = z.astype(jnp.bfloat16).astype(jnp.float32)
    h = zq @ f32(w1) + b1
    h = jnp.where(h > 0, h, NEG_SLOPE * h)
    h = h.astype(jnp.bfloat16).astype(jnp.float32) @ f32(w2) + b2
    h = jnp.where(h > 0, h, NEG_SLOPE * h)
    return h @ f32(w3r).T + b3


if __name__ == "__main__":
    key = jax.random.PRNGKey(0)
    k_params, k_z = jax.random.split(key)

    B, z_dim = 2, 32
    params = init_discriminator_params(k_params, z_dim)
    z = jax.random.normal(k_z, (B, z_dim), jnp.float32)

    preds = discriminator_forward(z, params)
    preds = jax.block_until_ready(preds)

    assert preds.shape == (B, 1), preds.shape
    ref = _reference_forward(z, params)
    assert jnp.allclose(preds, ref, atol=5e-2, rtol=5e-2), (preds, ref)

    print("KERNEL_OK")
</pallas_src>

<mosaic_0001>
module attributes {stable_mosaic.version = 11 : i64} {
  func.func @discriminator_kernel(%arg0: i32, %arg1: memref<128x32xf32, #tpu.memory_space<vmem>>, %arg2: memref<32x512xbf16, #tpu.memory_space<vmem>>, %arg3: memref<1x512xf32, #tpu.memory_space<vmem>>, %arg4: memref<512x512xbf16, #tpu.memory_space<vmem>>, %arg5: memref<1x512xf32, #tpu.memory_space<vmem>>, %arg6: memref<1x512xf32, #tpu.memory_space<vmem>>, %arg7: memref<1x1xf32, #tpu.memory_space<vmem>>, %arg8: memref<1x1x128xf32, #tpu.memory_space<vmem>>) attributes {dimension_semantics = [#tpu.dimension_semantics<parallel>], iteration_bounds = array<i64: 1>, scalar_prefetch = 0 : i64, scratch_operands = 0 : i64, tpu.core_type = #tpu.core_type<tc>, window_params = [{transform_indices = @transform_0, window_bounds = array<i64: 128, 32>}, {pipeline_mode = #tpu.pipeline_mode<synchronous>, transform_indices = @transform_1, window_bounds = array<i64: 32, 512>}, {pipeline_mode = #tpu.pipeline_mode<synchronous>, transform_indices = @transform_2, window_bounds = array<i64: 1, 512>}, {pipeline_mode = #tpu.pipeline_mode<synchronous>, transform_indices = @transform_3, window_bounds = array<i64: 512, 512>}, {pipeline_mode = #tpu.pipeline_mode<synchronous>, transform_indices = @transform_4, window_bounds = array<i64: 1, 512>}, {pipeline_mode = #tpu.pipeline_mode<synchronous>, transform_indices = @transform_5, window_bounds = array<i64: 1, 512>}, {pipeline_mode = #tpu.pipeline_mode<synchronous>, transform_indices = @transform_6, window_bounds = array<i64: 1, 1>}, {transform_indices = @transform_7, window_bounds = array<i64: 1, 1, 128>}]} {
    %c0 = arith.constant 0 : index
    %c0_0 = arith.constant 0 : index
    %0 = vector.load %arg1[%c0, %c0_0] : memref<128x32xf32, #tpu.memory_space<vmem>>, vector<128x32xf32>
    %1 = arith.truncf %0 : vector<128x32xf32> to vector<128x32xbf16>
    %c0_1 = arith.constant 0 : index
    %c0_2 = arith.constant 0 : index
    %2 = vector.load %arg2[%c0_1, %c0_2] : memref<32x512xbf16, #tpu.memory_space<vmem>>, vector<32x512xbf16>
    %cst = arith.constant dense<0.000000e+00> : vector<128x512xf32>
    %3 = tpu.matmul %1, %2, %cst {dimension_numbers = #tpu.dot_dimension_numbers<[1], [0], [0], [1], [0, 0, 1, 1], [], []>} : vector<128x32xbf16>, vector<32x512xbf16>, vector<128x512xf32> -> vector<128x512xf32>
    %c0_3 = arith.constant 0 : index
    %c0_4 = arith.constant 0 : index
    %4 = vector.load %arg3[%c0_3, %c0_4] : memref<1x512xf32, #tpu.memory_space<vmem>>, vector<1x512xf32>
    %5 = vector.broadcast %4 : vector<1x512xf32> to vector<128x512xf32>
    %6 = arith.addf %3, %5 : vector<128x512xf32>
    %cst_5 = arith.constant 0.000000e+00 : f32
    %7 = vector.broadcast %cst_5 : f32 to vector<128x512xf32>
    %8 = arith.cmpf ogt, %6, %7 : vector<128x512xf32>
    %cst_6 = arith.constant 2.000000e-01 : f32
    %9 = vector.broadcast %cst_6 : f32 to vector<128x512xf32>
    %10 = arith.mulf %9, %6 : vector<128x512xf32>
    %11 = arith.select %8, %6, %10 : vector<128x512xi1>, vector<128x512xf32>
    %12 = arith.truncf %11 : vector<128x512xf32> to vector<128x512xbf16>
    %c0_7 = arith.constant 0 : index
    %c0_8 = arith.constant 0 : index
    %13 = vector.load %arg4[%c0_7, %c0_8] : memref<512x512xbf16, #tpu.memory_space<vmem>>, vector<512x512xbf16>
    %cst_9 = arith.constant dense<0.000000e+00> : vector<128x512xf32>
    %14 = tpu.matmul %12, %13, %cst_9 {dimension_numbers = #tpu.dot_dimension_numbers<[1], [0], [0], [1], [0, 0, 1, 1], [], []>} : vector<128x512xbf16>, vector<512x512xbf16>, vector<128x512xf32> -> vector<128x512xf32>
    %c0_10 = arith.constant 0 : index
    %c0_11 = arith.constant 0 : index
    %15 = vector.load %arg5[%c0_10, %c0_11] : memref<1x512xf32, #tpu.memory_space<vmem>>, vector<1x512xf32>
    %16 = vector.broadcast %15 : vector<1x512xf32> to vector<128x512xf32>
    %17 = arith.addf %14, %16 : vector<128x512xf32>
    %cst_12 = arith.constant 0.000000e+00 : f32
    %18 = vector.broadcast %cst_12 : f32 to vector<128x512xf32>
    %19 = arith.cmpf ogt, %17, %18 : vector<128x512xf32>
    %cst_13 = arith.constant 2.000000e-01 : f32
    %20 = vector.broadcast %cst_13 : f32 to vector<128x512xf32>
    %21 = arith.mulf %20, %17 : vector<128x512xf32>
    %22 = arith.select %19, %17, %21 : vector<128x512xi1>, vector<128x512xf32>
    %c0_14 = arith.constant 0 : index
    %c0_15 = arith.constant 0 : index
    %23 = vector.load %arg6[%c0_14, %c0_15] : memref<1x512xf32, #tpu.memory_space<vmem>>, vector<1x512xf32>
    %24 = vector.broadcast %23 : vector<1x512xf32> to vector<128x512xf32>
    %25 = arith.mulf %22, %24 : vector<128x512xf32>
    %cst_16 = arith.constant dense<0.000000e+00> : vector<128xf32>
    %26 = vector.multi_reduction <add>, %25, %cst_16 [1] : vector<128x512xf32> to vector<128xf32>
    %27 = vector.shape_cast %26 : vector<128xf32> to vector<128x1xf32>
    %c0_17 = arith.constant 0 : index
    %c0_18 = arith.constant 0 : index
    %28 = vector.load %arg7[%c0_17, %c0_18] : memref<1x1xf32, #tpu.memory_space<vmem>>, vector<1x1xf32>
    %29 = vector.broadcast %28 : vector<1x1xf32> to vector<128x1xf32>
    %30 = arith.addf %27, %29 : vector<128x1xf32>
    %31 = vector.shape_cast %30 : vector<128x1xf32> to vector<1x1x128xf32>
    %c0_19 = arith.constant 0 : index
    %c0_20 = arith.constant 0 : index
    %c0_21 = arith.constant 0 : index
    %32 = vector.load %arg8[%c0_19, %c0_20, %c0_21] : memref<1x1x128xf32, #tpu.memory_space<vmem>>, vector<1x1x128xf32>
    tpu.vector_store %arg8[%c0_19, %c0_20, %c0_21], %31 {strides = array<i32>} : memref<1x1x128xf32, #tpu.memory_space<vmem>>, vector<1x1x128xf32>,
    return
  }
  func.func @transform_0(%arg0: i32) -> (i32, i32) {
    %c0_i32 = arith.constant 0 : i32
    %c0_i32_0 = arith.constant 0 : i32
    return %arg0, %c0_i32 : i32, i32
  }
  func.func @transform_1(%arg0: i32) -> (i32, i32) {
    %c0_i32 = arith.constant 0 : i32
    %c0_i32_0 = arith.constant 0 : i32
    %c0_i32_1 = arith.constant 0 : i32
    return %c0_i32, %c0_i32_0 : i32, i32
  }
  func.func @transform_2(%arg0: i32) -> (i32, i32) {
    %c0_i32 = arith.constant 0 : i32
    %c0_i32_0 = arith.constant 0 : i32
    %c0_i32_1 = arith.constant 0 : i32
    return %c0_i32, %c0_i32_0 : i32, i32
  }
  func.func @transform_3(%arg0: i32) -> (i32, i32) {
    %c0_i32 = arith.constant 0 : i32
    %c0_i32_0 = arith.constant 0 : i32
    %c0_i32_1 = arith.constant 0 : i32
    return %c0_i32, %c0_i32_0 : i32, i32
  }
  func.func @transform_4(%arg0: i32) -> (i32, i32) {
    %c0_i32 = arith.constant 0 : i32
    %c0_i32_0 = arith.constant 0 : i32
    %c0_i32_1 = arith.constant 0 : i32
    return %c0_i32, %c0_i32_0 : i32, i32
  }
  func.func @transform_5(%arg0: i32) -> (i32, i32) {
    %c0_i32 = arith.constant 0 : i32
    %c0_i32_0 = arith.constant 0 : i32
    %c0_i32_1 = arith.constant 0 : i32
    return %c0_i32, %c0_i32_0 : i32, i32
  }
  func.func @transform_6(%arg0: i32) -> (i32, i32) {
    %c0_i32 = arith.constant 0 : i32
    %c0_i32_0 = arith.constant 0 : i32
    %c0_i32_1 = arith.constant 0 : i32
    return %c0_i32, %c0_i32_0 : i32, i32
  }
  func.func @transform_7(%arg0: i32) -> (i32, i32, i32) {
    %c0_i32 = arith.constant 0 : i32
    %c0_i32_0 = arith.constant 0 : i32
    %c0_i32_1 = arith.constant 0 : i32
    return %arg0, %c0_i32, %c0_i32_0 : i32, i32, i32
  }
}

</mosaic_0001>

<bundles_post_ra>
// kernel: discriminator_forward.1
= control target key start
LH: loop header
LB: loop body
LE: loop exit
PB: predicated region body
PF: predicated region fallthrough
CT: control target
= control target key end

     0   :  { %s3888_s0 = inlined_call_operand.vmem [shape: f32[128,32], index: 0, kind: input, shape index: {}]   ;;  %s3889_s1 = inlined_call_operand.vmem [shape: bf16[32,512], index: 1, kind: input, shape index: {}]   ;;  %s3890_s2 = inlined_call_operand.vmem [shape: f32[1,512], index: 2, kind: input, shape index: {}]   ;;  %s3891_s3 = inlined_call_operand.hbm [shape: bf16[512,512], index: 3, kind: input, shape index: {}]   ;;  %s3892_s4 = inlined_call_operand.vmem [shape: f32[1,512], index: 4, kind: input, shape index: {}]   ;;  %s3893_s5 = inlined_call_operand.vmem [shape: f32[1,512], index: 5, kind: input, shape index: {}]   ;;  %s3894_s6 = inlined_call_operand.<no memory space> [shape: f32[1,1], index: 6, kind: input, shape index: {}]   ;;  %s3895_s7 = inlined_call_operand.vmem [shape: f32[1,1,128], index: 7, kind: output, shape index: {}]  }
   0x1   :  { %v12_v0 = vstv %s3894_s6 }
   0x2   :  { %13 = vst [vmem:[#allocation2] sm:$0x1] %v12_v0 }
   0x3   :  { %14 = vsyncpa [#allocation4], 0  ;;  %s2802_s26 = smov [#allocation3]  }
   0x4   :  { %s26_s27 = sshll.u32 %s2802_s26, 4  ;;  %s27_s27 = int_to_ptr.vmem [resolvable:$true] %s26_s27 }
   0x5   :  { %s2788_s28 = scalar_lea.vmem %s27_s27, 16384  ;;  %p2793_p1 = scmp.lt.s32.totalorder %s27_s27, %s27_s27 }
   0x6   :  { %p2789_p0 = scmp.ne.s32.totalorder %s27_s27, %s2788_s28  ;;  %p2794_p2 = scmp.lt.s32.totalorder %s2788_s28, %s2788_s28 }
   0x8   :  { %p2795_p3 = por %p2794_p2, %p2793_p1 }
   0xa   :  { %p2796_p4 = pnand %p2795_p3, %p2789_p0 }
   0xc   :  { %2799 = shalt.err (!%p2796_p4)
}
   0xd   :  { %s2803_s29 = smov 256   ;;  %s2804_s30 = smov 16  }
   0xe   :  { %32 = dma.hbm_to_vmem [thread:$0]  %s3891_s3, 16384, %s27_s27, [#allocation4], %s2803_s29, %s2803_s29, %s2804_s30  }
   0xf   :  { %2800 = dma.done.wait [#allocation4], 16384  }
  0x10   :  { %2801 = vsyncadd [#allocation4], 4294950912  ;;  %v2805_v1 = vmov 0   ;;  %v2576_v2 = vld [vmem:[%s3889_s1 + $0x24] ss:$16 sps:$4 sm:$0xff]   ;;  %v44_v11 = vld [vmem:[%s3888_s0 + $0x8] sm:$0xff] }
  0x11   :  { %194 = vmatprep.mubr.bf16.mxu0 %v2805_v1  ;;  %307 = vmatprep.mubr.bf16.mxu1 %v2805_v1  ;;  %v2578_v3 = vld [vmem:[%s3889_s1 + $0x2c] ss:$16 sps:$4 sm:$0xff]   ;;  %v2580_v4 = vld [vmem:[%s3889_s1 + $0x20] ss:$16 sps:$4 sm:$0xff]   ;;  %v2581_v5 = vld [vmem:[%s3889_s1 + $0x28] ss:$16 sps:$4 sm:$0xff]  }
  0x12   :  { %2574 = vset.pattern.permute.xlu0 %v2805_v1  ;;  %2575 = vset.pattern.permute.xlu1 %v2805_v1  ;;  %v2582_v6 = vld [vmem:[%s3889_s1 + $0x4] ss:$16 sps:$4 sm:$0xff]   ;;  %v2584_v7 = vld [vmem:[%s3889_s1 + $0xc] ss:$16 sps:$4 sm:$0xff]   ;;  %v2586_v8 = vld [vmem:[%s3889_s1] ss:$16 sps:$4 sm:$0xff]  }
  0x13   :  { %174 = vmatprep.subr.bf16.mxu0 %v2576_v2  ;;  %287 = vmatprep.subr.bf16.mxu1 %v2578_v3  ;;  %v2587_v9 = vld [vmem:[%s3889_s1 + $0x8] ss:$16 sps:$4 sm:$0xff]   ;;  %v43_v10 = vld [vmem:[%s3888_s0] sm:$0xff]  ;;  %vm137_vm0 = vcmask 261120   ;;  %v45_v13 = vld [vmem:[%s3888_s0 + $0x10] sm:$0xff] }
  0x14   :  { %175 = vmatpush1.bf16.msra.mxu0 %v2580_v4  ;;  %288 = vmatpush1.bf16.msra.mxu1 %v2581_v5  ;;  %v59_v12 = vpack.c.bf16 %v44_v11, %v43_v10  ;;  %v46_v14 = vld [vmem:[%s3888_s0 + $0x18] sm:$0xff]  ;;  %v2588_v15 = vld [vmem:[#allocation3 + $0xe0] ss:$16 sps:$4 sm:$0xff]   ;;  %v48_v29 = vld [vmem:[%s3888_s0 + $0x28] sm:$0xff] }
  0x15   :  { %176 = vmatprep.subr.bf16.mxu0 %v2582_v6  ;;  %289 = vmatprep.subr.bf16.mxu1 %v2584_v7  ;;  %v2590_v16 = vld [vmem:[#allocation3 + $0xe4] ss:$16 sps:$4 sm:$0xff]   ;;  %v2591_v17 = vld [vmem:[#allocation3 + $0x2e0] ss:$16 sps:$4 sm:$0xff]   ;;  %v60_v21 = vpack.c.bf16 %v46_v14, %v45_v13 }
  0x16   :  { %v2593_v18 = vld [vmem:[#allocation3 + $0x2e4] ss:$16 sps:$4 sm:$0xff]   ;;  %v2594_v19 = vld [vmem:[#allocation3 + $0xc0] ss:$16 sps:$4 sm:$0xff]  }
  0x17   :  { %v2596_v20 = vld [vmem:[#allocation3 + $0xc4] ss:$16 sps:$4 sm:$0xff]   ;;  %v2597_v23 = vld [vmem:[#allocation3 + $0x2c0] ss:$16 sps:$4 sm:$0xff]  }
  0x18   :  { %177 = vmatpush1.bf16.msra.mxu0 %v2586_v8  ;;  %290 = vmatpush1.bf16.msra.mxu1 %v2587_v9  ;;  %v2599_v22 = vld [vmem:[#allocation3 + $0x2c4] ss:$16 sps:$4 sm:$0xff]   ;;  %v2600_v25 = vld [vmem:[#allocation3 + $0xa0] ss:$16 sps:$4 sm:$0xff]  }
  0x19   :  { %1402 = vmatprep.subr.bf16.mxu0 %v2590_v16  ;;  %1515 = vmatprep.subr.bf16.mxu1 %v2593_v18  ;;  %v2602_v24 = vld [vmem:[#allocation3 + $0xa4] ss:$16 sps:$4 sm:$0xff]   ;;  %v2603_v30 = vld [vmem:[#allocation3 + $0x2a0] ss:$16 sps:$4 sm:$0xff]  }
  0x1a   :  { %v2605_v26 = vld [vmem:[#allocation3 + $0x2a4] ss:$16 sps:$4 sm:$0xff]   ;;  %v2606_v31 = vld [vmem:[#allocation3 + $0x80] ss:$16 sps:$4 sm:$0xff]  }
  0x1b   :  { %2425 = vmatmul.mubr.msk.bf16.vlgmr.msra.gmra.mxu0 %vm137_vm0, %v59_v12  ;;  %2433 = vmatmul.mubr.msk.bf16.vlgmr.msra.gmra.mxu1 %vm137_vm0, %v59_v12  ;;  %v47_v27 = vld [vmem:[%s3888_s0 + $0x20] sm:$0xff]  ;;  %v49_v38 = vld [vmem:[%s3888_s0 + $0x30] sm:$0xff]  ;;  %v50_v40 = vld [vmem:[%s3888_s0 + $0x38] sm:$0xff] }
  0x1c   :  { %204 = vmatprep.mubr.bf16.mxu0 %v2805_v1  ;;  %317 = vmatprep.mubr.bf16.mxu1 %v2805_v1  ;;  %v2608_v28 = vld [vmem:[#allocation3 + $0x84] ss:$16 sps:$4 sm:$0xff]   ;;  %v61_v33 = vpack.c.bf16 %v48_v29, %v47_v27  ;;  %v2609_v34 = vld [vmem:[#allocation3 + $0x280] ss:$16 sps:$4 sm:$0xff]   ;;  %v62_v44 = vpack.c.bf16 %v50_v40, %v49_v38 }
  0x1d   :  { %1403 = vmatpush1.bf16.msra.mxu0 %v2588_v15  ;;  %1516 = vmatpush1.bf16.msra.mxu1 %v2591_v17  ;;  %v2611_v32 = vld [vmem:[#allocation3 + $0x284] ss:$16 sps:$4 sm:$0xff]   ;;  %v2612_v36 = vld [vmem:[#allocation3 + $0x60] ss:$16 sps:$4 sm:$0xff]  }
  0x1e   :  { %1404 = vmatprep.subr.bf16.mxu0 %v2596_v20  ;;  %1517 = vmatprep.subr.bf16.mxu1 %v2599_v22  ;;  %v2614_v35 = vld [vmem:[#allocation3 + $0x64] ss:$16 sps:$4 sm:$0xff]   ;;  %v2615_v41 = vld [vmem:[#allocation3 + $0x260] ss:$16 sps:$4 sm:$0xff]  }
  0x1f   :  { %v2617_v37 = vld [vmem:[#allocation3 + $0x264] ss:$16 sps:$4 sm:$0xff]   ;;  %v2618_v42 = vld [vmem:[#allocation3 + $0x40] ss:$16 sps:$4 sm:$0xff]  }
  0x20   :  { %v2620_v39 = vld [vmem:[#allocation3 + $0x44] ss:$16 sps:$4 sm:$0xff]   ;;  %v2621_v45 = vld [vmem:[#allocation3 + $0x240] ss:$16 sps:$4 sm:$0xff]  }
  0x21   :  { %1405 = vmatpush1.bf16.msra.mxu0 %v2594_v19  ;;  %1518 = vmatpush1.bf16.msra.mxu1 %v2597_v23  ;;  %v2623_v43 = vld [vmem:[#allocation3 + $0x244] ss:$16 sps:$4 sm:$0xff]   ;;  %v2624_v47 = vld [vmem:[#allocation3 + $0x20] ss:$16 sps:$4 sm:$0xff]  }
  0x22   :  { %1406 = vmatprep.subr.bf16.mxu0 %v2602_v24  ;;  %1519 = vmatprep.subr.bf16.mxu1 %v2605_v26  ;;  %v2626_v46 = vld [vmem:[#allocation3 + $0x24] ss:$16 sps:$4 sm:$0xff]   ;;  %v2627_v52 = vld [vmem:[#allocation3 + $0x220] ss:$16 sps:$4 sm:$0xff]  }
  0x23   :  { %2426 = vmatmul.mubr.msk.bf16.gmra.mxu0 %vm137_vm0, %v60_v21  ;;  %2434 = vmatmul.mubr.msk.bf16.gmra.mxu1 %vm137_vm0, %v60_v21  ;;  %v2629_v48 = vld [vmem:[#allocation3 + $0x224] ss:$16 sps:$4 sm:$0xff]   ;;  %v2630_v53 = vld [vmem:[#allocation3] ss:$16 sps:$4 sm:$0xff]  }
  0x24   :  { %214 = vmatprep.mubr.bf16.mxu0 %v2805_v1  ;;  %327 = vmatprep.mubr.bf16.mxu1 %v2805_v1  ;;  %v51_v49 = vld [vmem:[%s3888_s0 + $0x40] sm:$0xff]  ;;  %v52_v51 = vld [vmem:[%s3888_s0 + $0x48] sm:$0xff]  ;;  %v53_v58 = vld [vmem:[%s3888_s0 + $0x50] sm:$0xff] }
  0x25   :  { %1407 = vmatpush1.bf16.msra.mxu0 %v2600_v25  ;;  %1520 = vmatpush1.bf16.msra.mxu1 %v2603_v30  ;;  %v2632_v50 = vld [vmem:[#allocation3 + $0x4] ss:$16 sps:$4 sm:$0xff]   ;;  %v63_v55 = vpack.c.bf16 %v52_v51, %v51_v49  ;;  %v2633_v56 = vld [vmem:[#allocation3 + $0x200] ss:$16 sps:$4 sm:$0xff]  }
  0x26   :  { %1408 = vmatprep.subr.bf16.mxu0 %v2608_v28  ;;  %1521 = vmatprep.subr.bf16.mxu1 %v2611_v32  ;;  %v2635_v54 = vld [vmem:[#allocation3 + $0x204] ss:$16 sps:$4 sm:$0xff]   ;;  %v2636_v59 = vld [vmem:[#allocation3 + $0x1e0] ss:$16 sps:$4 sm:$0xff]  }
  0x27   :  { %v2638_v57 = vld [vmem:[#allocation3 + $0x1e4] ss:$16 sps:$4 sm:$0xff]   ;;  %v2639_v63 = vld [vmem:[#allocation3 + $0x3e0] ss:$16 sps:$4 sm:$0xff]  }
  0x28   :  { %v2641_v60 = vld [vmem:[#allocation3 + $0x3e4] ss:$16 sps:$4 sm:$0xff]   ;;  %v2642_v0 = vld [vmem:[#allocation3 + $0x1c0] ss:$16 sps:$4 sm:$0xff]  }
  0x29   :  { %1409 = vmatpush1.bf16.msra.mxu0 %v2606_v31  ;;  %1522 = vmatpush1.bf16.msra.mxu1 %v2609_v34  ;;  %v54_v61 = vld [vmem:[%s3888_s0 + $0x58] sm:$0xff]  ;;  %v2645_v4 = vld [vmem:[#allocation3 + $0x3c0] ss:$16 sps:$4 sm:$0xff]   ;;  %v56_v10 = vld [vmem:[%s3888_s0 + $0x68] sm:$0xff] }
  0x2a   :  { %1410 = vmatprep.subr.bf16.mxu0 %v2614_v35  ;;  %1523 = vmatprep.subr.bf16.mxu1 %v2617_v37  ;;  %v2644_v62 = vld [vmem:[#allocation3 + $0x1c4] ss:$16 sps:$4 sm:$0xff]   ;;  %v64_v3 = vpack.c.bf16 %v54_v61, %v53_v58  ;;  %v2648_v6 = vld [vmem:[#allocation3 + $0x1a0] ss:$16 sps:$4 sm:$0xff]   ;;  %v2686_v34 = vld [vmem:[#allocation3 + $0xec] ss:$16 sps:$4 sm:$0xff]  }
  0x2b   :  { %2427 = vmatmul.mubr.msk.bf16.gmra.mxu0 %vm137_vm0, %v61_v33  ;;  %2435 = vmatmul.mubr.msk.bf16.gmra.mxu1 %vm137_vm0, %v61_v33  ;;  %v2647_v2 = vld [vmem:[#allocation3 + $0x3c4] ss:$16 sps:$4 sm:$0xff]   ;;  %v2651_v11 = vld [vmem:[#allocation3 + $0x3a0] ss:$16 sps:$4 sm:$0xff]   ;;  %v2689_v35 = vld [vmem:[#allocation3 + $0x2ec] ss:$16 sps:$4 sm:$0xff]  }
  0x2c   :  { %224 = vmatprep.mubr.bf16.mxu0 %v2805_v1  ;;  %337 = vmatprep.mubr.bf16.mxu1 %v2805_v1  ;;  %v2650_v5 = vld [vmem:[#allocation3 + $0x1a4] ss:$16 sps:$4 sm:$0xff]   ;;  %v2654_v12 = vld [vmem:[#allocation3 + $0x180] ss:$16 sps:$4 sm:$0xff]  }
  0x2d   :  { %1411 = vmatpush1.bf16.msra.mxu0 %v2612_v36  ;;  %1524 = vmatpush1.bf16.msra.mxu1 %v2615_v41  ;;  %v2653_v7 = vld [vmem:[#allocation3 + $0x3a4] ss:$16 sps:$4 sm:$0xff]   ;;  %v2657_v15 = vld [vmem:[#allocation3 + $0x380] ss:$16 sps:$4 sm:$0xff]   ;;  %v3896_v36 = vlaneseq }
  0x2e   :  { %1412 = vmatprep.subr.bf16.mxu0 %v2620_v39  ;;  %1525 = vmatprep.subr.bf16.mxu1 %v2623_v43  ;;  %v2656_v8 = vld [vmem:[#allocation3 + $0x184] ss:$16 sps:$4 sm:$0xff]   ;;  %v2660_v17 = vld [vmem:[#allocation3 + $0x160] ss:$16 sps:$4 sm:$0xff]  }
  0x2f   :  { %v55_v9 = vld [vmem:[%s3888_s0 + $0x60] sm:$0xff]  ;;  %v57_v19 = vld [vmem:[%s3888_s0 + $0x70] sm:$0xff]  ;;  %v58_v20 = vld [vmem:[%s3888_s0 + $0x78] sm:$0xff]  ;;  %v2959_v37 = vshrl.u32 %v3896_v36, 7 }
  0x30   :  { %v2659_v13 = vld [vmem:[#allocation3 + $0x384] ss:$16 sps:$4 sm:$0xff]   ;;  %v65_v14 = vpack.c.bf16 %v56_v10, %v55_v9  ;;  %v2663_v21 = vld [vmem:[#allocation3 + $0x360] ss:$16 sps:$4 sm:$0xff]   ;;  %v66_v22 = vpack.c.bf16 %v58_v20, %v57_v19 }
  0x31   :  { %1413 = vmatpush1.bf16.msra.mxu0 %v2618_v42  ;;  %1526 = vmatpush1.bf16.msra.mxu1 %v2621_v45  ;;  %v2662_v16 = vld [vmem:[#allocation3 + $0x164] ss:$16 sps:$4 sm:$0xff]   ;;  %v2666_v25 = vld [vmem:[#allocation3 + $0x140] ss:$16 sps:$4 sm:$0xff]   ;;  %3909 = vst [vmem:[#allocation6_spill] sm:$0xff] %v2959_v37  ;;  %v2962_v38 = vsub.s32 0, %v2959_v37 }
  0x32   :  { %1414 = vmatprep.subr.bf16.mxu0 %v2626_v46  ;;  %1527 = vmatprep.subr.bf16.mxu1 %v2629_v48  ;;  %v2665_v18 = vld [vmem:[#allocation3 + $0x364] ss:$16 sps:$4 sm:$0xff]   ;;  %v2669_v26 = vld [vmem:[#allocation3 + $0x340] ss:$16 sps:$4 sm:$0xff]   ;;  %v2968_v40 = vsub.s32 2, %v2959_v37  ;;  %v2971_v41 = vsub.s32 1, %v2959_v37 }
  0x33   :  { %2428 = vmatmul.mubr.msk.bf16.gmra.mxu0 %vm137_vm0, %v62_v44  ;;  %2436 = vmatmul.mubr.msk.bf16.gmra.mxu1 %vm137_vm0, %v62_v44  ;;  %v2668_v23 = vld [vmem:[#allocation3 + $0x144] ss:$16 sps:$4 sm:$0xff]   ;;  %v2672_v28 = vld [vmem:[#allocation3 + $0x120] ss:$16 sps:$4 sm:$0xff]   ;;  %3910 = vst [vmem:[#allocation7_spill] sm:$0xff] %v2962_v38  ;;  %v2974_v42 = vsub.s32 3, %v2959_v37 }
  0x34   :  { %234 = vmatprep.mubr.bf16.mxu0 %v2805_v1  ;;  %347 = vmatprep.mubr.bf16.mxu1 %v2805_v1  ;;  %v2671_v24 = vld [vmem:[#allocation3 + $0x344] ss:$16 sps:$4 sm:$0xff]   ;;  %v2675_v29 = vld [vmem:[#allocation3 + $0x320] ss:$16 sps:$4 sm:$0xff]   ;;  %3911 = vst [vmem:[#allocation8_spill] sm:$0xff] %v2968_v40  ;;  %3912 = vst [vmem:[#allocation9_spill] sm:$0xff] %v2971_v41 }
  0x35   :  { %1415 = vmatpush1.bf16.msra.mxu0 %v2624_v47  ;;  %1528 = vmatpush1.bf16.msra.mxu1 %v2627_v52  ;;  %v2674_v27 = vld [vmem:[#allocation3 + $0x124] ss:$16 sps:$4 sm:$0xff]   ;;  %v2678_v32 = vld [vmem:[#allocation3 + $0x100] ss:$16 sps:$4 sm:$0xff]   ;;  %3913 = vst [vmem:[#allocation10_spill] sm:$0xff] %v2974_v42 }
  0x36   :  { %1416 = vmatprep.subr.bf16.mxu0 %v2632_v50  ;;  %1529 = vmatprep.subr.bf16.mxu1 %v2635_v54  ;;  %v2680_v30 = vld [vmem:[#allocation3 + $0x104] ss:$16 sps:$4 sm:$0xff]   ;;  %v2681_v33 = vld [vmem:[#allocation3 + $0x300] ss:$16 sps:$4 sm:$0xff]  }
  0x37   :  { %v2683_v31 = vld [vmem:[#allocation3 + $0x304] ss:$16 sps:$4 sm:$0xff]   ;;  %v75_v39 = vld [vmem:[%s3890_s2] sm:$0xf] }
  0x38   :  { %v2977_v43 = vrot.slane %v75_v39, %v2962_v38  ;;  %v2980_v45 = vrot.slane %v75_v39, %v2968_v40  ;;  %v2983_v47 = vrot.slane %v75_v39, %v2971_v41  ;;  %v2986_v48 = vrot.slane %v75_v39, %v2974_v42 }
  0x39   :  { %1417 = vmatpush1.bf16.msra.mxu0 %v2630_v53  ;;  %1530 = vmatpush1.bf16.msra.mxu1 %v2633_v56 }
  0x3a   :  { %1418 = vmatprep.subr.bf16.mxu0 %v2638_v57  ;;  %1531 = vmatprep.subr.bf16.mxu1 %v2641_v60 }
  0x3b   :  { %2429 = vmatmul.mubr.msk.bf16.gmra.mxu0 %vm137_vm0, %v63_v55  ;;  %2437 = vmatmul.mubr.msk.bf16.gmra.mxu1 %vm137_vm0, %v63_v55 }
  0x3c   :  { %244 = vmatprep.mubr.bf16.mxu0 %v2805_v1  ;;  %357 = vmatprep.mubr.bf16.mxu1 %v2805_v1 }
  0x3d   :  { %1419 = vmatpush2.bf16.msra.mxu0 %v2636_v59  ;;  %1532 = vmatpush2.bf16.msra.mxu1 %v2639_v63 }
  0x3e   :  { %1420 = vmatprep.subr.bf16.mxu0 %v2644_v62  ;;  %1533 = vmatprep.subr.bf16.mxu1 %v2647_v2 }
  0x41   :  { %1421 = vmatpush2.bf16.msra.mxu0 %v2642_v0  ;;  %1534 = vmatpush2.bf16.msra.mxu1 %v2645_v4 }
  0x42   :  { %1422 = vmatprep.subr.bf16.mxu0 %v2650_v5  ;;  %1535 = vmatprep.subr.bf16.mxu1 %v2653_v7 }
  0x43   :  { %2430 = vmatmul.mubr.msk.bf16.gmra.mxu0 %vm137_vm0, %v64_v3  ;;  %2438 = vmatmul.mubr.msk.bf16.gmra.mxu1 %vm137_vm0, %v64_v3 }
  0x44   :  { %254 = vmatprep.mubr.bf16.mxu0 %v2805_v1  ;;  %367 = vmatprep.mubr.bf16.mxu1 %v2805_v1 }
  0x45   :  { %1423 = vmatpush2.bf16.msra.mxu0 %v2648_v6  ;;  %1536 = vmatpush2.bf16.msra.mxu1 %v2651_v11 }
  0x46   :  { %1424 = vmatprep.subr.bf16.mxu0 %v2656_v8  ;;  %1537 = vmatprep.subr.bf16.mxu1 %v2659_v13 }
  0x49   :  { %1425 = vmatpush2.bf16.msra.mxu0 %v2654_v12  ;;  %1538 = vmatpush2.bf16.msra.mxu1 %v2657_v15 }
  0x4a   :  { %1426 = vmatprep.subr.bf16.mxu0 %v2662_v16  ;;  %1539 = vmatprep.subr.bf16.mxu1 %v2665_v18 }
  0x4b   :  { %2431 = vmatmul.mubr.msk.bf16.gmra.mxu0 %vm137_vm0, %v65_v14  ;;  %2439 = vmatmul.mubr.msk.bf16.gmra.mxu1 %vm137_vm0, %v65_v14 }
  0x4c   :  { %264 = vmatprep.mubr.bf16.mxu0 %v2805_v1  ;;  %377 = vmatprep.mubr.bf16.mxu1 %v2805_v1  ;;  %v2677_v1 = vld [vmem:[#allocation3 + $0x324] ss:$16 sps:$4 sm:$0xff]  }
  0x4d   :  { %1427 = vmatpush2.bf16.msra.mxu0 %v2660_v17  ;;  %1540 = vmatpush2.bf16.msra.mxu1 %v2663_v21 }
  0x4e   :  { %1428 = vmatprep.subr.bf16.mxu0 %v2668_v23  ;;  %1541 = vmatprep.subr.bf16.mxu1 %v2671_v24 }
  0x51   :  { %1429 = vmatpush2.bf16.msra.mxu0 %v2666_v25  ;;  %1542 = vmatpush2.bf16.msra.mxu1 %v2669_v26 }
  0x52   :  { %1430 = vmatprep.subr.bf16.mxu0 %v2674_v27  ;;  %1543 = vmatprep.subr.bf16.mxu1 %v2677_v1 }
  0x53   :  { %2432 = vmatmul.mubr.msk.bf16.gmra.mxu0 %vm137_vm0, %v66_v22  ;;  %2440 = vmatmul.mubr.msk.bf16.gmra.mxu1 %vm137_vm0, %v66_v22 }
  0x55   :  { %1431 = vmatpush2.bf16.msra.mxu0 %v2672_v28  ;;  %1544 = vmatpush2.bf16.msra.mxu1 %v2675_v29 }
  0x56   :  { %1432 = vmatprep.subr.bf16.mxu0 %v2680_v30  ;;  %1545 = vmatprep.subr.bf16.mxu1 %v2683_v31  ;;  %v2684_v30 = vld [vmem:[#allocation3 + $0xe8] ss:$16 sps:$4 sm:$0xff]  }
  0x57   :  { %v2687_v31 = vld [vmem:[#allocation3 + $0x2e8] ss:$16 sps:$4 sm:$0xff]  }
  0x59   :  { %1433 = vmatpush2.bf16.msra.mxu0 %v2678_v32  ;;  %1546 = vmatpush2.bf16.msra.mxu1 %v2681_v33 }
  0x5a   :  { %1628 = vmatprep.subr.bf16.mxu0 %v2686_v34  ;;  %1741 = vmatprep.subr.bf16.mxu1 %v2689_v35 }
  0xdb   :  { %v196_v44 = vpop.f32.mrf.mxu0  ;;  %v309_v46 = vpop.f32.mrf.mxu1 }
  0xdc   :  { %v197_v51 = vadd.f32 %v196_v44, %v2977_v43  ;;  %v310_v52 = vadd.f32 %v309_v46, %v2980_v45  ;;  %v2692_v44 = vld [vmem:[#allocation3 + $0xcc] ss:$16 sps:$4 sm:$0xff]  }
  0xdd   :  { %v198_v49 = vpop.f32.mrf.mxu0  ;;  %v311_v50 = vpop.f32.mrf.mxu1  ;;  %v2695_v46 = vld [vmem:[#allocation3 + $0x2cc] ss:$16 sps:$4 sm:$0xff]  }
  0xde   :  { %v199_v55 = vadd.f32 %v198_v49, %v2983_v47  ;;  %v312_v56 = vadd.f32 %v311_v50, %v2986_v48  ;;  %vm388_vm1 = vcmp.gt.f32.partialorder %v197_v51, 0.0  ;;  %v452_v61 = vmul.f32 0.2, %v197_v51 }
  0xdf   :  { %v200_v53 = vpop.f32.mrf.mxu0  ;;  %v313_v54 = vpop.f32.mrf.mxu1  ;;  %v454_v62 = vmul.f32 0.2, %v310_v52  ;;  %vm390_vm2 = vcmp.gt.f32.partialorder %v310_v52, 0.0 }
  0xe0   :  { %v201_v57 = vadd.f32 %v200_v53, %v2977_v43  ;;  %v314_v58 = vadd.f32 %v313_v54, %v2980_v45  ;;  %v453_v4 = vmul.f32 0.2, %v199_v55  ;;  %v455_v5 = vmul.f32 0.2, %v312_v56 }
  0xe1   :  { %v202_v59 = vpop.f32.mrf.mxu0  ;;  %v315_v60 = vpop.f32.mrf.mxu1  ;;  %vm389_vm7 = vcmp.gt.f32.partialorder %v199_v55, 0.0  ;;  %vm391_vm8 = vcmp.gt.f32.partialorder %v312_v56, 0.0  ;;  %v516_v17 = vsel %vm388_vm1, %v197_v51, %v452_v61  ;;  %v518_v18 = vsel %vm390_vm2, %v310_v52, %v454_v62 }
  0xe2   :  { %v203_v63 = vadd.f32 %v202_v59, %v2983_v47  ;;  %v316_v0 = vadd.f32 %v315_v60, %v2986_v48  ;;  %v456_v6 = vmul.f32 0.2, %v201_v57  ;;  %v458_v7 = vmul.f32 0.2, %v314_v58 }
  0xe3   :  { %v206_v2 = vpop.f32.mrf.mxu0  ;;  %v319_v3 = vpop.f32.mrf.mxu1  ;;  %vm392_vm4 = vcmp.gt.f32.partialorder %v201_v57, 0.0  ;;  %vm394_vm5 = vcmp.gt.f32.partialorder %v314_v58, 0.0  ;;  %v517_v25 = vsel %vm389_vm7, %v199_v55, %v453_v4  ;;  %v519_v26 = vsel %vm391_vm8, %v312_v56, %v455_v5  ;;  %v2690_v55 = vld [vmem:[#allocation3 + $0xc8] ss:$16 sps:$4 sm:$0xff]  }
  0xe4   :  { %vm393_vm3 = vcmp.gt.f32.partialorder %v203_v63, 0.0  ;;  %v457_v8 = vmul.f32 0.2, %v203_v63  ;;  %vm395_vm6 = vcmp.gt.f32.partialorder %v316_v0, 0.0  ;;  %v459_v11 = vmul.f32 0.2, %v316_v0 }
  0xe5   :  { %v208_v9 = vpop.f32.mrf.mxu0  ;;  %v321_v10 = vpop.f32.mrf.mxu1  ;;  %v520_v19 = vsel %vm392_vm4, %v201_v57, %v456_v6  ;;  %v522_v20 = vsel %vm394_vm5, %v314_v58, %v458_v7  ;;  %v207_v49 = vadd.f32 %v206_v2, %v2977_v43  ;;  %v320_v53 = vadd.f32 %v319_v3, %v2980_v45  ;;  %v2693_v58 = vld [vmem:[#allocation3 + $0x2c8] ss:$16 sps:$4 sm:$0xff]   ;;  %v2698_v2 = vld [vmem:[#allocation3 + $0xac] ss:$16 sps:$4 sm:$0xff]  }
  0xe6   :  { %v209_v12 = vadd.f32 %v208_v9, %v2983_v47  ;;  %v521_v15 = vsel %vm393_vm3, %v203_v63, %v457_v8  ;;  %v523_v16 = vsel %vm395_vm6, %v316_v0, %v459_v11  ;;  %v322_v24 = vadd.f32 %v321_v10, %v2986_v48  ;;  %v2701_v6 = vld [vmem:[#allocation3 + $0x2ac] ss:$16 sps:$4 sm:$0xff]  }
  0xe7   :  { %v210_v13 = vpop.f32.mrf.mxu0  ;;  %v323_v14 = vpop.f32.mrf.mxu1  ;;  %v3002_v28 = vpack.c.bf16 %v521_v15, %v517_v25  ;;  %v3004_v29 = vpack.c.bf16 %v523_v16, %v519_v26  ;;  %v3006_v34 = vpack.c.bf16 %v520_v19, %v516_v17  ;;  %v3008_v35 = vpack.c.bf16 %v522_v20, %v518_v18 }
  0xe8   :  { %v461_v23 = vmul.f32 0.2, %v209_v12  ;;  %vm397_vm9 = vcmp.gt.f32.partialorder %v209_v12, 0.0  ;;  %v211_v39 = vadd.f32 %v210_v13, %v2977_v43  ;;  %v324_v54 = vadd.f32 %v323_v14, %v2980_v45  ;;  %v2696_v13 = vld [vmem:[#allocation3 + $0xa8] ss:$16 sps:$4 sm:$0xff]  }
  0xe9   :  { %v212_v21 = vpop.f32.mrf.mxu0  ;;  %v325_v22 = vpop.f32.mrf.mxu1  ;;  %1434 = vmatprep.mubr.bf16.mxu0 %v3002_v28  ;;  %1547 = vmatprep.mubr.bf16.mxu1 %v3004_v29  ;;  %v463_v56 = vmul.f32 0.2, %v322_v24  ;;  %vm399_vm11 = vcmp.gt.f32.partialorder %v322_v24, 0.0  ;;  %vm396_vm13 = vcmp.gt.f32.partialorder %v207_v49, 0.0  ;;  %v460_v3 = vmul.f32 0.2, %v207_v49 }
  0xea   :  { %v213_v27 = vadd.f32 %v212_v21, %v2983_v47  ;;  %v326_v1 = vadd.f32 %v325_v22, %v2986_v48  ;;  %1435 = vmatmul.mubr.bf16.vlgmr.msra.gmra.mxu0 %v3006_v34  ;;  %1548 = vmatmul.mubr.bf16.vlgmr.msra.gmra.mxu1 %v3008_v35  ;;  %v525_v61 = vsel %vm397_vm9, %v209_v12, %v461_v23  ;;  %v464_v63 = vmul.f32 0.2, %v211_v39  ;;  %v2699_v14 = vld [vmem:[#allocation3 + $0x2a8] ss:$16 sps:$4 sm:$0xff]   ;;  %v2704_v21 = vld [vmem:[#allocation3 + $0x8c] ss:$16 sps:$4 sm:$0xff]  }
  0xeb   :  { %v216_v32 = vpop.f32.mrf.mxu0  ;;  %v329_v33 = vpop.f32.mrf.mxu1  ;;  %1629 = vmatpush1.bf16.msra.mxu0 %v2684_v30  ;;  %1742 = vmatpush1.bf16.msra.mxu1 %v2687_v31  ;;  %vm400_vm14 = vcmp.gt.f32.partialorder %v211_v39, 0.0  ;;  %vm398_vm15 = vcmp.gt.f32.partialorder %v320_v53, 0.0  ;;  %v462_v7 = vmul.f32 0.2, %v320_v53  ;;  %v466_v8 = vmul.f32 0.2, %v324_v54 }
  0xec   :  { %vm401_vm10 = vcmp.gt.f32.partialorder %v213_v27, 0.0  ;;  %v465_v50 = vmul.f32 0.2, %v213_v27  ;;  %v467_v57 = vmul.f32 0.2, %v326_v1  ;;  %vm403_vm12 = vcmp.gt.f32.partialorder %v326_v1, 0.0  ;;  %1630 = vmatprep.subr.bf16.mxu0 %v2692_v44  ;;  %1743 = vmatprep.subr.bf16.mxu1 %v2695_v46 }
  0xed   :  { %v218_v51 = vpop.f32.mrf.mxu0  ;;  %v331_v52 = vpop.f32.mrf.mxu1  ;;  %v3023_v9 = vadd.f32 %v216_v32, %v2977_v43  ;;  %vm402_vm0 = vcmp.gt.f32.partialorder %v324_v54, 0.0  ;;  %v527_v11 = vsel %vm399_vm11, %v322_v24, %v463_v56  ;;  %v3030_v17 = vadd.f32 %v329_v33, %v2980_v45  ;;  %v2707_v30 = vld [vmem:[#allocation3 + $0x28c] ss:$16 sps:$4 sm:$0xff]   ;;  %v2705_v44 = vld [vmem:[#allocation3 + $0x288] ss:$16 sps:$4 sm:$0xff]  }
  0xee   :  { %v529_v62 = vsel %vm401_vm10, %v213_v27, %v465_v50  ;;  %v531_v12 = vsel %vm403_vm12, %v326_v1, %v467_v57  ;;  %v3033_v18 = vadd.f32 %v218_v51, %v2983_v47  ;;  %v528_v20 = vsel %vm400_vm14, %v211_v39, %v464_v63  ;;  %v2702_v1 = vld [vmem:[#allocation3 + $0x88] ss:$16 sps:$4 sm:$0xff]   ;;  %v2710_v46 = vld [vmem:[#allocation3 + $0x6c] ss:$16 sps:$4 sm:$0xff]  }
  0xef   :  { %v220_v59 = vpop.f32.mrf.mxu0  ;;  %v333_v60 = vpop.f32.mrf.mxu1  ;;  %v3020_v0 = vpack.c.bf16 %v529_v62, %v525_v61  ;;  %1631 = vmatpush1.bf16.msra.mxu0 %v2690_v55  ;;  %1744 = vmatpush1.bf16.msra.mxu1 %v2693_v58  ;;  %v3035_v19 = vpack.c.bf16 %v531_v12, %v527_v11  ;;  %v332_v22 = vadd.f32 %v331_v52, %v2986_v48  ;;  %v2713_v50 = vld [vmem:[#allocation3 + $0x26c] ss:$16 sps:$4 sm:$0xff]   ;;  %vm404_vm1 = vcmp.gt.f32.partialorder %v3023_v9, 0.0  ;;  %v2711_v12 = vld [vmem:[#allocation3 + $0x268] ss:$16 sps:$4 sm:$0xff]  }
  0xf0   :  { %1632 = vmatprep.subr.bf16.mxu0 %v2698_v2  ;;  %v3040_v23 = vadd.f32 %v220_v59, %v2977_v43  ;;  %v3043_v24 = vadd.f32 %v333_v60, %v2980_v45  ;;  %v524_v25 = vsel %vm396_vm13, %v207_v49, %v460_v3  ;;  %1745 = vmatprep.subr.bf16.mxu1 %v2701_v6  ;;  %v468_v49 = vmul.f32 0.2, %v3023_v9 }
  0xf1   :  { %v222_v4 = vpop.f32.mrf.mxu0  ;;  %v335_v5 = vpop.f32.mrf.mxu1  ;;  %1444 = vmatprep.mubr.bf16.mxu0 %v3020_v0  ;;  %1557 = vmatprep.mubr.bf16.mxu1 %v3035_v19  ;;  %v3048_v32 = vpack.c.bf16 %v528_v20, %v524_v25  ;;  %v526_v33 = vsel %vm398_vm15, %v320_v53, %v462_v7  ;;  %v530_v39 = vsel %vm402_vm0, %v324_v54, %v466_v8  ;;  %vm406_vm2 = vcmp.gt.f32.partialorder %v3030_v17, 0.0 }
  0xf2   :  { %v223_v10 = vadd.f32 %v222_v4, %v2983_v47  ;;  %v336_v31 = vadd.f32 %v335_v5, %v2986_v48  ;;  %v3054_v52 = vpack.c.bf16 %v530_v39, %v526_v33  ;;  %v470_v53 = vmul.f32 0.2, %v3030_v17  ;;  %v2708_v4 = vld [vmem:[#allocation3 + $0x68] ss:$16 sps:$4 sm:$0xff]   ;;  %v2719_v39 = vld [vmem:[#allocation3 + $0x24c] ss:$16 sps:$4 sm:$0xff]  }
  0xf3   :  { %v226_v15 = vpop.f32.mrf.mxu0  ;;  %v339_v16 = vpop.f32.mrf.mxu1  ;;  %1633 = vmatpush1.bf16.msra.mxu0 %v2696_v13  ;;  %1746 = vmatpush1.bf16.msra.mxu1 %v2699_v14  ;;  %vm405_vm3 = vcmp.gt.f32.partialorder %v3033_v18, 0.0  ;;  %v469_v54 = vmul.f32 0.2, %v3033_v18  ;;  %vm407_vm5 = vcmp.gt.f32.partialorder %v332_v22, 0.0  ;;  %v471_v57 = vmul.f32 0.2, %v332_v22 }
  0xf4   :  { %v473_v51 = vmul.f32 0.2, %v223_v10  ;;  %vm409_vm4 = vcmp.gt.f32.partialorder %v223_v10, 0.0  ;;  %1445 = vmatmul.mubr.bf16.gmra.mxu0 %v3048_v32  ;;  %1634 = vmatprep.subr.bf16.mxu0 %v2704_v21  ;;  %vm408_vm6 = vcmp.gt.f32.partialorder %v3040_v23, 0.0  ;;  %v472_v60 = vmul.f32 0.2, %v3040_v23 }
  0xf5   :  { %v228_v26 = vpop.f32.mrf.mxu0  ;;  %v341_v27 = vpop.f32.mrf.mxu1  ;;  %1558 = vmatmul.mubr.bf16.gmra.mxu1 %v3054_v52  ;;  %1747 = vmatprep.subr.bf16.mxu1 %v2707_v30  ;;  %v474_v61 = vmul.f32 0.2, %v3043_v24  ;;  %v475_v62 = vmul.f32 0.2, %v336_v31  ;;  %vm411_vm7 = vcmp.gt.f32.partialorder %v336_v31, 0.0  ;;  %v3066_v63 = vadd.f32 %v226_v15, %v2977_v43 }
  0xf6   :  { %v3069_v2 = vadd.f32 %v339_v16, %v2980_v45  ;;  %v537_v3 = vsel %vm409_vm4, %v223_v10, %v473_v51  ;;  %vm410_vm8 = vcmp.gt.f32.partialorder %v3043_v24, 0.0  ;;  %v3076_v7 = vadd.f32 %v228_v26, %v2983_v47  ;;  %v2716_v30 = vld [vmem:[#allocation3 + $0x4c] ss:$16 sps:$4 sm:$0xff]  }
  0xf7   :  { %v230_v55 = vpop.f32.mrf.mxu0  ;;  %v343_v56 = vpop.f32.mrf.mxu1  ;;  %1635 = vmatpush1.bf16.msra.mxu0 %v2702_v1  ;;  %1748 = vmatpush1.bf16.msra.mxu1 %v2705_v44  ;;  %v3079_v8 = vadd.f32 %v341_v27, %v2986_v48  ;;  %v533_v14 = vsel %vm405_vm3, %v3033_v18, %v469_v54  ;;  %v535_v15 = vsel %vm407_vm5, %v332_v22, %v471_v57  ;;  %v2714_v1 = vld [vmem:[#allocation3 + $0x48] ss:$16 sps:$4 sm:$0xff]   ;;  %vm412_vm9 = vcmp.gt.f32.partialorder %v3066_v63, 0.0 }
  0xf8   :  { %v3082_v11 = vadd.f32 %v230_v55, %v2977_v43  ;;  %1636 = vmatprep.subr.bf16.mxu0 %v2710_v46  ;;  %1749 = vmatprep.subr.bf16.mxu1 %v2713_v50  ;;  %v3094_v21 = vpack.c.bf16 %v537_v3, %v533_v14  ;;  %v539_v25 = vsel %vm411_vm7, %v336_v31, %v475_v62  ;;  %v476_v50 = vmul.f32 0.2, %v3066_v63  ;;  %v2720_v54 = vld [vmem:[#allocation3 + $0x28] ss:$16 sps:$4 sm:$0xff]  }
  0xf9   :  { %v232_v58 = vpop.f32.mrf.mxu0  ;;  %v345_v59 = vpop.f32.mrf.mxu1  ;;  %v532_v26 = vsel %vm404_vm1, %v3023_v9, %v468_v49  ;;  %v536_v27 = vsel %vm408_vm6, %v3040_v23, %v472_v60  ;;  %v3103_v33 = vpack.c.bf16 %v539_v25, %v535_v15  ;;  %v534_v22 = vsel %vm406_vm2, %v3030_v17, %v470_v53  ;;  %v2717_v9 = vld [vmem:[#allocation3 + $0x248] ss:$16 sps:$4 sm:$0xff]   ;;  %v2722_v23 = vld [vmem:[#allocation3 + $0x2c] ss:$16 sps:$4 sm:$0xff]  }
  0xfa   :  { %v3085_v10 = vadd.f32 %v232_v58, %v2983_v47  ;;  %v3088_v13 = vadd.f32 %v345_v59, %v2986_v48  ;;  %v3105_v18 = vpack.c.bf16 %v536_v27, %v532_v26  ;;  %v538_v31 = vsel %vm410_vm8, %v3043_v24, %v474_v61  ;;  %1454 = vmatprep.mubr.bf16.mxu0 %v3094_v21  ;;  %v2725_v24 = vld [vmem:[#allocation3 + $0x22c] ss:$16 sps:$4 sm:$0xff]  }
  0xfb   :  { %v236_v5 = vpop.f32.mrf.mxu0  ;;  %v3072_v6 = vpop.f32.mrf.mxu1  ;;  %1637 = vmatpush1.bf16.msra.mxu0 %v2708_v4  ;;  %v3118_v49 = vadd.f32 %v343_v56, %v2980_v45  ;;  %v3121_v17 = vpack.c.bf16 %v538_v31, %v534_v22  ;;  %1750 = vmatpush1.bf16.msra.mxu1 %v2711_v12  ;;  %vm414_vm10 = vcmp.gt.f32.partialorder %v3069_v2, 0.0  ;;  %v478_v51 = vmul.f32 0.2, %v3069_v2  ;;  %v2723_v12 = vld [vmem:[#allocation3 + $0x228] ss:$16 sps:$4 sm:$0xff]  }
  0xfc   :  { %vm413_vm11 = vcmp.gt.f32.partialorder %v3076_v7, 0.0  ;;  %v481_v55 = vmul.f32 0.2, %v3085_v10  ;;  %1567 = vmatprep.mubr.bf16.mxu1 %v3103_v33  ;;  %1455 = vmatmul.mubr.bf16.gmra.mxu0 %v3105_v18  ;;  %v477_v57 = vmul.f32 0.2, %v3076_v7  ;;  %vm417_vm12 = vcmp.gt.f32.partialorder %v3085_v10, 0.0 }
  0xfd   :  { %v238_v16 = vpop.f32.mrf.mxu0  ;;  %v351_v20 = vpop.f32.mrf.mxu1  ;;  %v479_v58 = vmul.f32 0.2, %v3079_v8  ;;  %1568 = vmatmul.mubr.bf16.gmra.mxu1 %v3121_v17  ;;  %v3134_v59 = vadd.f32 %v236_v5, %v2977_v43  ;;  %1638 = vmatprep.subr.bf16.mxu0 %v2716_v30  ;;  %vm415_vm13 = vcmp.gt.f32.partialorder %v3079_v8, 0.0  ;;  %vm416_vm14 = vcmp.gt.f32.partialorder %v3082_v11, 0.0  ;;  %v2728_v30 = vld [vmem:[#allocation3 + $0xc] ss:$16 sps:$4 sm:$0xff]  }
  0xfe   :  { %v480_v60 = vmul.f32 0.2, %v3082_v11  ;;  %v483_v61 = vmul.f32 0.2, %v3088_v13  ;;  %1751 = vmatprep.subr.bf16.mxu1 %v2719_v39  ;;  %vm418_vm15 = vcmp.gt.f32.partialorder %v3118_v49, 0.0  ;;  %vm419_vm0 = vcmp.gt.f32.partialorder %v3088_v13, 0.0 }
  0xff   :  { %v240_v44 = vpop.f32.mrf.mxu0  ;;  %v3113_v46 = vpop.f32.mrf.mxu1  ;;  %1639 = vmatpush1.bf16.msra.mxu0 %v2714_v1  ;;  %v482_v4 = vmul.f32 0.2, %v3118_v49  ;;  %v3145_v5 = vadd.f32 %v3072_v6, %v2980_v45  ;;  %1752 = vmatpush1.bf16.msra.mxu1 %v2717_v9  ;;  %v3148_v14 = vadd.f32 %v238_v16, %v2983_v47  ;;  %v3151_v15 = vadd.f32 %v351_v20, %v2986_v48  ;;  %v2731_v39 = vld [vmem:[#allocation3 + $0x20c] ss:$16 sps:$4 sm:$0xff]  }
 0x100   :  { %1640 = vmatprep.subr.bf16.mxu0 %v2722_v23  ;;  %v3154_v25 = vadd.f32 %v240_v44, %v2977_v43  ;;  %v545_v26 = vsel %vm417_vm12, %v3085_v10, %v481_v55  ;;  %1753 = vmatprep.subr.bf16.mxu1 %v2725_v24  ;;  %vm420_vm1 = vcmp.gt.f32.partialorder %v3134_v59, 0.0  ;;  %v541_v20 = vsel %vm413_vm11, %v3076_v7, %v477_v57  ;;  %v2726_v55 = vld [vmem:[#allocation3 + $0x8] ss:$16 sps:$4 sm:$0xff]   ;;  %v2734_v57 = vld [vmem:[#allocation3 + $0x1ec] ss:$16 sps:$4 sm:$0xff]  }
 0x101   :  { %v242_v56 = vpop.f32.mrf.mxu0  ;;  %v355_v53 = vpop.f32.mrf.mxu1  ;;  %v3166_v22 = vmul.f32 0.2, %v3134_v59  ;;  %v3168_v31 = vpack.c.bf16 %v545_v26, %v541_v20  ;;  %v543_v10 = vsel %vm415_vm13, %v3079_v8, %v479_v58  ;;  %v547_v9 = vsel %vm419_vm0, %v3088_v13, %v483_v61 }
 0x102   :  { %v243_v1 = vadd.f32 %v242_v56, %v2983_v47  ;;  %v356_v16 = vadd.f32 %v355_v53, %v2986_v48  ;;  %vm422_vm2 = vcmp.gt.f32.partialorder %v3145_v5, 0.0  ;;  %v3177_v7 = vpack.c.bf16 %v547_v9, %v543_v10 }
 0x103   :  { %v246_v62 = vpop.f32.mrf.mxu0  ;;  %v359_v3 = vpop.f32.mrf.mxu1  ;;  %1641 = vmatpush1.bf16.msra.mxu0 %v2720_v54  ;;  %v540_v24 = vsel %vm412_vm9, %v3066_v63, %v476_v50  ;;  %v544_v8 = vsel %vm416_vm14, %v3082_v11, %v480_v60  ;;  %1754 = vmatpush1.bf16.msra.mxu1 %v2723_v12  ;;  %v3187_v13 = vadd.f32 %v3113_v46, %v2980_v45  ;;  %v2729_v50 = vld [vmem:[#allocation3 + $0x208] ss:$16 sps:$4 sm:$0xff]   ;;  %v486_v58 = vmul.f32 0.2, %v3145_v5 }
 0x104   :  { %1464 = vmatprep.mubr.bf16.mxu0 %v3168_v31  ;;  %v3190_v56 = vpack.c.bf16 %v544_v8, %v540_v24  ;;  %v542_v53 = vsel %vm414_vm10, %v3069_v2, %v478_v51  ;;  %v546_v63 = vsel %vm418_vm15, %v3118_v49, %v482_v4  ;;  %v489_v46 = vmul.f32 0.2, %v243_v1  ;;  %1577 = vmatprep.mubr.bf16.mxu1 %v3177_v7  ;;  %v2732_v12 = vld [vmem:[#allocation3 + $0x1e8] ss:$16 sps:$4 sm:$0xff]   ;;  %v2737_v4 = vld [vmem:[#allocation3 + $0x3ec] ss:$16 sps:$4 sm:$0xff]  }
 0x105   :  { %v248_v27 = vpop.f32.mrf.mxu0  ;;  %v361_v6 = vpop.f32.mrf.mxu1  ;;  %v491_v60 = vmul.f32 0.2, %v356_v16  ;;  %v3200_v61 = vpack.c.bf16 %v546_v63, %v542_v53  ;;  %1642 = vmatprep.subr.bf16.mxu0 %v2728_v30  ;;  %vm425_vm3 = vcmp.gt.f32.partialorder %v243_v1, 0.0  ;;  %vm427_vm4 = vcmp.gt.f32.partialorder %v356_v16, 0.0  ;;  %1755 = vmatprep.subr.bf16.mxu1 %v2731_v39  ;;  %v2735_v51 = vld [vmem:[#allocation3 + $0x3e8] ss:$16 sps:$4 sm:$0xff]  }
 0x106   :  { %1465 = vmatmul.mubr.bf16.gmra.mxu0 %v3190_v56  ;;  %v3204_v2 = vadd.f32 %v246_v62, %v2977_v43  ;;  %v3207_v49 = vadd.f32 %v359_v3, %v2980_v45  ;;  %vm421_vm5 = vcmp.gt.f32.partialorder %v3148_v14, 0.0  ;;  %v485_v30 = vmul.f32 0.2, %v3148_v14  ;;  %v2740_v63 = vld [vmem:[#allocation3 + $0x1cc] ss:$16 sps:$4 sm:$0xff]  }
 0x107   :  { %v250_v44 = vpop.f32.mrf.mxu0  ;;  %v363_v23 = vpop.f32.mrf.mxu1  ;;  %vm423_vm6 = vcmp.gt.f32.partialorder %v3151_v15, 0.0  ;;  %v487_v10 = vmul.f32 0.2, %v3151_v15  ;;  %1578 = vmatmul.mubr.bf16.gmra.mxu1 %v3200_v61  ;;  %1643 = vmatpush1.bf16.msra.mxu0 %v2726_v55  ;;  %vm424_vm7 = vcmp.gt.f32.partialorder %v3154_v25, 0.0  ;;  %v488_v62 = vmul.f32 0.2, %v3154_v25 }
 0x108   :  { %vm426_vm8 = vcmp.gt.f32.partialorder %v3187_v13, 0.0  ;;  %v490_v3 = vmul.f32 0.2, %v3187_v13  ;;  %1756 = vmatpush1.bf16.msra.mxu1 %v2729_v50  ;;  %v3219_v24 = vadd.f32 %v248_v27, %v2983_v47  ;;  %v3222_v8 = vadd.f32 %v361_v6, %v2986_v48  ;;  %1644 = vmatprep.subr.bf16.mxu0 %v2734_v57  ;;  %v2743_v57 = vld [vmem:[#allocation3 + $0x3cc] ss:$16 sps:$4 sm:$0xff]  }
 0x109   :  { %v252_v11 = vpop.f32.mrf.mxu0  ;;  %v365_v54 = vpop.f32.mrf.mxu1  ;;  %v553_v53 = vsel %vm425_vm3, %v243_v1, %v489_v46  ;;  %v555_v55 = vsel %vm427_vm4, %v356_v16, %v491_v60  ;;  %v3227_v36 = vmul.f32 0.2, %v3204_v2  ;;  %v3230_v37 = vmul.f32 0.2, %v3207_v49  ;;  %1757 = vmatprep.subr.bf16.mxu1 %v2737_v4 }
 0x10a   :  { %v3233_v50 = vadd.f32 %v250_v44, %v2977_v43  ;;  %v3236_v27 = vadd.f32 %v363_v23, %v2980_v45  ;;  %vm428_vm9 = vcmp.gt.f32.partialorder %v3204_v2, 0.0  ;;  %vm430_vm10 = vcmp.gt.f32.partialorder %v3207_v49, 0.0 }
 0x10b   :  { %v256_v26 = vpop.f32.mrf.mxu0  ;;  %v369_v20 = vpop.f32.mrf.mxu1  ;;  %v3243_v1 = vadd.f32 %v252_v11, %v2983_v47  ;;  %v3246_v16 = vadd.f32 %v365_v54, %v2986_v48  ;;  %v549_v44 = vsel %vm421_vm5, %v3148_v14, %v485_v30  ;;  %v551_v23 = vsel %vm423_vm6, %v3151_v15, %v487_v10  ;;  %1645 = vmatpush2.bf16.msra.mxu0 %v2732_v12  ;;  %v2738_v14 = vld [vmem:[#allocation3 + $0x1c8] ss:$16 sps:$4 sm:$0xff]  }
 0x10c   :  { %v3254_v46 = vpack.c.bf16 %v553_v53, %v549_v44  ;;  %v3256_v60 = vpack.c.bf16 %v555_v55, %v551_v23  ;;  %v548_v11 = vsel %vm420_vm1, %v3134_v59, %v3166_v22  ;;  %v552_v54 = vsel %vm424_vm7, %v3154_v25, %v488_v62  ;;  %1758 = vmatpush2.bf16.msra.mxu1 %v2735_v51  ;;  %v2741_v22 = vld [vmem:[#allocation3 + $0x3c8] ss:$16 sps:$4 sm:$0xff]   ;;  %v2746_v25 = vld [vmem:[#allocation3 + $0x1ac] ss:$16 sps:$4 sm:$0xff]  }
 0x10d   :  { %v258_v9 = vpop.f32.mrf.mxu0  ;;  %v371_v39 = vpop.f32.mrf.mxu1  ;;  %v3265_v15 = vpack.c.bf16 %v552_v54, %v548_v11  ;;  %v550_v12 = vsel %vm422_vm2, %v3145_v5, %v486_v58  ;;  %v554_v10 = vsel %vm426_vm8, %v3187_v13, %v490_v3  ;;  %v3274_v59 = vadd.f32 %v256_v26, %v2977_v43  ;;  %1646 = vmatprep.subr.bf16.mxu0 %v2740_v63  ;;  %v2744_v13 = vld [vmem:[#allocation3 + $0x1a8] ss:$16 sps:$4 sm:$0xff]   ;;  %v2749_v26 = vld [vmem:[#allocation3 + $0x3ac] ss:$16 sps:$4 sm:$0xff]  }
 0x10e   :  { %vm429_vm11 = vcmp.gt.f32.partialorder %v3219_v24, 0.0  ;;  %1474 = vmatprep.mubr.bf16.mxu0 %v3254_v46  ;;  %1587 = vmatprep.mubr.bf16.mxu1 %v3256_v60  ;;  %v3279_v51 = vpack.c.bf16 %v554_v10, %v550_v12  ;;  %v3282_v5 = vadd.f32 %v369_v20, %v2980_v45  ;;  %v3285_v58 = vadd.f32 %v258_v9, %v2983_v47  ;;  %v2747_v9 = vld [vmem:[#allocation3 + $0x3a8] ss:$16 sps:$4 sm:$0xff]   ;;  %v2752_v44 = vld [vmem:[#allocation3 + $0x18c] ss:$16 sps:$4 sm:$0xff]  }
 0x10f   :  { %v260_v6 = vpop.f32.mrf.mxu0  ;;  %v3238_v42 = vpop.f32.mrf.mxu1  ;;  %3914 = vst [vmem:[#allocation11_spill] sm:$0xff] %v3265_v15  ;;  %v493_v53 = vmul.f32 0.2, %v3219_v24  ;;  %v497_v55 = vmul.f32 0.2, %v3243_v1  ;;  %1475 = vmatmul.mubr.bf16.gmra.mxu0 %v3265_v15  ;;  %v3296_v20 = vadd.f32 %v371_v39, %v2986_v48  ;;  %1759 = vmatprep.subr.bf16.mxu1 %v2743_v57  ;;  %vm431_vm12 = vcmp.gt.f32.partialorder %v3222_v8, 0.0 }
 0x110   :  { %3915 = vst [vmem:[#allocation12_spill] sm:$0xff] %v3279_v51  ;;  %v499_v63 = vmul.f32 0.2, %v3246_v16  ;;  %v495_v23 = vmul.f32 0.2, %v3222_v8  ;;  %vm433_vm13 = vcmp.gt.f32.partialorder %v3243_v1, 0.0  ;;  %1588 = vmatmul.mubr.bf16.gmra.mxu1 %v3279_v51  ;;  %1647 = vmatpush2.bf16.msra.mxu0 %v2738_v14  ;;  %v3316_v40 = vadd.f32 %v260_v6, %v2977_v43 }
 0x111   :  { %v262_v4 = vpop.f32.mrf.mxu0  ;;  %v375_v30 = vpop.f32.mrf.mxu1  ;;  %vm435_vm14 = vcmp.gt.f32.partialorder %v3246_v16, 0.0  ;;  %v2755_v11 = vld [vmem:[#allocation3 + $0x38c] ss:$16 sps:$4 sm:$0xff]   ;;  %vm432_vm15 = vcmp.gt.f32.partialorder %v3233_v50, 0.0  ;;  %v496_v39 = vmul.f32 0.2, %v3233_v50  ;;  %1760 = vmatpush2.bf16.msra.mxu1 %v2741_v22  ;;  %1648 = vmatprep.subr.bf16.mxu0 %v2746_v25  ;;  %v561_v22 = vsel %vm433_vm13, %v3243_v1, %v497_v55 }
 0x112   :  { %vm434_vm0 = vcmp.gt.f32.partialorder %v3236_v27, 0.0  ;;  %v498_v57 = vmul.f32 0.2, %v3236_v27  ;;  %vm436_vm1 = vcmp.gt.f32.partialorder %v3274_v59, 0.0  ;;  %v3309_v10 = vmul.f32 0.2, %v3274_v59  ;;  %1761 = vmatprep.subr.bf16.mxu1 %v2749_v26 }
 0x113   :  { %v3287_v62 = vpop.f32.mrf.mxu0  ;;  %v3289_v3 = vpop.f32.mrf.mxu1  ;;  %v3312_v14 = vmul.f32 0.2, %v3282_v5  ;;  %vm437_vm2 = vcmp.gt.f32.partialorder %v3285_v58, 0.0  ;;  %v3319_v41 = vmul.f32 0.2, %v3285_v58  ;;  %vm439_vm3 = vcmp.gt.f32.partialorder %v3296_v20, 0.0 }
 0x114   :  { %v563_v25 = vsel %vm435_vm14, %v3246_v16, %v499_v63  ;;  %vm438_vm4 = vcmp.gt.f32.partialorder %v3282_v5, 0.0  ;;  %v3331_v6 = vadd.f32 %v3238_v42, %v2980_v45  ;;  %v263_v26 = vadd.f32 %v262_v4, %v2983_v47  ;;  %1649 = vmatpush2.bf16.msra.mxu0 %v2744_v13  ;;  %v2750_v55 = vld [vmem:[#allocation3 + $0x188] ss:$16 sps:$4 sm:$0xff]  }
 0x115   :  { %v268_v54 = vpop.f32.mrf.mxu0  ;;  %v381_v12 = vpop.f32.mrf.mxu1  ;;  %v557_v38 = vsel %vm429_vm11, %v3219_v24, %v493_v53  ;;  %v559_v1 = vsel %vm431_vm12, %v3222_v8, %v495_v23  ;;  %v503_v16 = vmul.f32 0.2, %v3296_v20  ;;  %v376_v63 = vadd.f32 %v375_v30, %v2986_v48  ;;  %1762 = vmatpush2.bf16.msra.mxu1 %v2747_v9  ;;  %1650 = vmatprep.subr.bf16.mxu0 %v2752_v44  ;;  %v2753_v13 = vld [vmem:[#allocation3 + $0x388] ss:$16 sps:$4 sm:$0xff]   ;;  %v2758_v9 = vld [vmem:[#allocation3 + $0x16c] ss:$16 sps:$4 sm:$0xff]  }
 0x116   :  { %v3342_v51 = vpack.c.bf16 %v561_v22, %v557_v38  ;;  %v3344_v42 = vpack.c.bf16 %v563_v25, %v559_v1  ;;  %v556_v24 = vsel %vm428_vm9, %v3204_v2, %v3227_v36  ;;  %v560_v8 = vsel %vm432_vm15, %v3233_v50, %v496_v39  ;;  %1763 = vmatprep.subr.bf16.mxu1 %v2755_v11  ;;  %v2756_v53 = vld [vmem:[#allocation3 + $0x168] ss:$16 sps:$4 sm:$0xff]   ;;  %v2764_v23 = vld [vmem:[#allocation3 + $0x14c] ss:$16 sps:$4 sm:$0xff]  }
 0x117   :  { %v270_v4 = vpop.f32.mrf.mxu0  ;;  %v383_v15 = vpop.f32.mrf.mxu1  ;;  %v558_v38 = vsel %vm430_vm10, %v3207_v49, %v3230_v37  ;;  %v562_v30 = vsel %vm434_vm0, %v3236_v27, %v498_v57  ;;  %vm440_vm5 = vcmp.gt.f32.partialorder %v3316_v40, 0.0  ;;  %v504_v36 = vmul.f32 0.2, %v3316_v40  ;;  %v2761_v37 = vld [vmem:[#allocation3 + $0x36c] ss:$16 sps:$4 sm:$0xff]  }
 0x118   :  { %1484 = vmatprep.mubr.bf16.mxu0 %v3342_v51  ;;  %1597 = vmatprep.mubr.bf16.mxu1 %v3344_v42  ;;  %v3364_v2 = vpack.c.bf16 %v560_v8, %v556_v24  ;;  %v3366_v50 = vpack.c.bf16 %v562_v30, %v558_v38  ;;  %vm442_vm6 = vcmp.gt.f32.partialorder %v3331_v6, 0.0  ;;  %v505_v49 = vmul.f32 0.2, %v263_v26 }
 0x119   :  { %v269_v27 = vadd.f32 %v268_v54, %v2983_v47  ;;  %v382_v44 = vadd.f32 %v381_v12, %v2986_v48  ;;  %1651 = vmatpush2.bf16.msra.mxu0 %v2750_v55  ;;  %v506_v11 = vmul.f32 0.2, %v3331_v6  ;;  %vm441_vm7 = vcmp.gt.f32.partialorder %v263_v26, 0.0  ;;  %v272_v22 = vpop.f32.mrf.mxu0  ;;  %v385_v25 = vpop.f32.mrf.mxu1  ;;  %1764 = vmatpush2.bf16.msra.mxu1 %v2753_v13  ;;  %v2759_v55 = vld [vmem:[#allocation3 + $0x368] ss:$16 sps:$4 sm:$0xff]  }
 0x11a   :  { %v507_v39 = vmul.f32 0.2, %v376_v63  ;;  %1485 = vmatmul.mubr.bf16.gmra.mxu0 %v3364_v2  ;;  %1598 = vmatmul.mubr.bf16.gmra.mxu1 %v3366_v50  ;;  %v3376_v57 = vadd.f32 %v3287_v62, %v2977_v43  ;;  %vm443_vm8 = vcmp.gt.f32.partialorder %v376_v63, 0.0  ;;  %v3380_v54 = vadd.f32 %v3289_v3, %v2980_v45  ;;  %v2767_v3 = vld [vmem:[#allocation3 + $0x34c] ss:$16 sps:$4 sm:$0xff]  }
 0x11b   :  { %v3383_v12 = vadd.f32 %v270_v4, %v2977_v43  ;;  %v3386_v1 = vadd.f32 %v383_v15, %v2980_v45  ;;  %1652 = vmatprep.subr.bf16.mxu0 %v2758_v9  ;;  %vm445_vm9 = vcmp.gt.f32.partialorder %v269_v27, 0.0  ;;  %v509_v24 = vmul.f32 0.2, %v269_v27  ;;  %1765 = vmatprep.subr.bf16.mxu1 %v2761_v37  ;;  %v2762_v15 = vld [vmem:[#allocation3 + $0x148] ss:$16 sps:$4 sm:$0xff]  }
 0x11c   :  { %vm447_vm10 = vcmp.gt.f32.partialorder %v382_v44, 0.0  ;;  %v511_v62 = vmul.f32 0.2, %v382_v44  ;;  %v273_v8 = vadd.f32 %v272_v22, %v2983_v47  ;;  %v386_v38 = vadd.f32 %v385_v25, %v2986_v48  ;;  %v2768_v37 = vld [vmem:[#allocation3 + $0x128] ss:$16 sps:$4 sm:$0xff]  }
 0x11d   :  { %v565_v43 = vsel %vm437_vm2, %v3285_v58, %v3319_v41  ;;  %v569_v45 = vsel %vm441_vm7, %v263_v26, %v505_v49  ;;  %1653 = vmatpush2.bf16.msra.mxu0 %v2756_v53  ;;  %v567_v30 = vsel %vm439_vm3, %v3296_v20, %v503_v16  ;;  %v571_v47 = vsel %vm443_vm8, %v376_v63, %v507_v39  ;;  %v2770_v41 = vld [vmem:[#allocation3 + $0x12c] ss:$16 sps:$4 sm:$0xff]   ;;  %v2765_v16 = vld [vmem:[#allocation3 + $0x348] ss:$16 sps:$4 sm:$0xff]  }
 0x11e   :  { %v3395_v4 = vpack.c.bf16 %v569_v45, %v565_v43  ;;  %v564_v48 = vsel %vm436_vm1, %v3274_v59, %v3309_v10  ;;  %1654 = vmatprep.subr.bf16.mxu0 %v2764_v23  ;;  %vm449_vm11 = vcmp.gt.f32.partialorder %v273_v8, 0.0  ;;  %v513_v58 = vmul.f32 0.2, %v273_v8  ;;  %1766 = vmatpush2.bf16.msra.mxu1 %v2759_v55  ;;  %v2773_v49 = vld [vmem:[#allocation3 + $0x32c] ss:$16 sps:$4 sm:$0xff]  }
 0x11f   :  { %vm451_vm12 = vcmp.gt.f32.partialorder %v386_v38, 0.0  ;;  %v515_v26 = vmul.f32 0.2, %v386_v38  ;;  %v3406_v13 = vpack.c.bf16 %v571_v47, %v567_v30  ;;  %v568_v20 = vsel %vm440_vm5, %v3316_v40, %v504_v36  ;;  %1767 = vmatprep.subr.bf16.mxu1 %v2767_v3  ;;  %v2771_v22 = vld [vmem:[#allocation3 + $0x328] ss:$16 sps:$4 sm:$0xff]  }
 0x120   :  { %1494 = vmatprep.mubr.bf16.mxu0 %v3395_v4  ;;  %v566_v59 = vsel %vm438_vm4, %v3282_v5, %v3312_v14  ;;  %v570_v10 = vsel %vm442_vm6, %v3331_v6, %v506_v11  ;;  %v512_v63 = vmul.f32 0.2, %v3383_v12  ;;  %v3419_v53 = vpack.c.bf16 %v568_v20, %v564_v48  ;;  %v2776_v11 = vld [vmem:[#allocation3 + $0x10c] ss:$16 sps:$4 sm:$0xff]  }
 0x121   :  { %v3421_v9 = vpack.c.bf16 %v570_v10, %v566_v59  ;;  %1655 = vmatpush2.bf16.msra.mxu0 %v2762_v15  ;;  %v573_v40 = vsel %vm445_vm9, %v269_v27, %v509_v24  ;;  %v514_v36 = vmul.f32 0.2, %v3386_v1  ;;  %1607 = vmatprep.mubr.bf16.mxu1 %v3406_v13  ;;  %v577_v5 = vsel %vm449_vm11, %v273_v8, %v513_v58  ;;  %v2779_v25 = vld [vmem:[#allocation3 + $0x30c] ss:$16 sps:$4 sm:$0xff]   ;;  %v2777_v15 = vld [vmem:[#allocation3 + $0x308] ss:$16 sps:$4 sm:$0xff]  }
 0x122   :  { %v575_v14 = vsel %vm447_vm10, %v382_v44, %v511_v62  ;;  %v579_v6 = vsel %vm451_vm12, %v386_v38, %v515_v26  ;;  %1656 = vmatprep.subr.bf16.mxu0 %v2770_v41  ;;  %vm448_vm13 = vcmp.gt.f32.partialorder %v3383_v12, 0.0  ;;  %vm450_vm14 = vcmp.gt.f32.partialorder %v3386_v1, 0.0  ;;  %1495 = vmatmul.mubr.bf16.gmra.mxu0 %v3419_v53  ;;  %v2774_v62 = vld [vmem:[#allocation3 + $0x108] ss:$16 sps:$4 sm:$0xff]  }
 0x123   :  { %1608 = vmatmul.mubr.bf16.gmra.mxu1 %v3421_v9  ;;  %v609_v27 = vpack.c.bf16 %v577_v5, %v573_v40  ;;  %v611_v23 = vpack.c.bf16 %v579_v6, %v575_v14  ;;  %v508_v39 = vmul.f32 0.2, %v3376_v57  ;;  %v510_v44 = vmul.f32 0.2, %v3380_v54  ;;  %v3919_v59 = vld [vmem:[#allocation9_spill] sm:$0xff] }
 0x124   :  { %1768 = vmatpush2.bf16.msra.mxu1 %v2765_v16  ;;  %vm444_vm15 = vcmp.gt.f32.partialorder %v3376_v57, 0.0  ;;  %vm446_vm0 = vcmp.gt.f32.partialorder %v3380_v54, 0.0  ;;  %v576_v55 = vsel %vm448_vm13, %v3383_v12, %v512_v63  ;;  %v578_v24 = vsel %vm450_vm14, %v3386_v1, %v514_v36 }
 0x125   :  { %1504 = vmatprep.mubr.bf16.mxu0 %v609_v27  ;;  %1617 = vmatprep.mubr.bf16.mxu1 %v611_v23  ;;  %v572_v8 = vsel %vm444_vm15, %v3376_v57, %v508_v39  ;;  %v574_v38 = vsel %vm446_vm0, %v3380_v54, %v510_v44 }
 0x126   :  { %1657 = vmatpush2.bf16.msra.mxu0 %v2768_v37  ;;  %1769 = vmatprep.subr.bf16.mxu1 %v2773_v49  ;;  %v608_v43 = vpack.c.bf16 %v576_v55, %v572_v8  ;;  %v610_v45 = vpack.c.bf16 %v578_v24, %v574_v38  ;;  %v2046_v55 = vld [vmem:[%s3893_s5] sm:$0xf] }
 0x127   :  { %1658 = vmatprep.subr.bf16.mxu0 %v2776_v11 }
 0x128   :  { %1770 = vmatpush2.bf16.msra.mxu1 %v2771_v22 }
 0x129   :  { %1771 = vmatprep.subr.bf16.mxu1 %v2779_v25 }
 0x12a   :  { %1659 = vmatpush2.bf16.msra.mxu0 %v2774_v62 }
 0x12b   :  { %1505 = vmatmul.mubr.bf16.gmra.mxu0 %v608_v43  ;;  %1618 = vmatmul.mubr.bf16.gmra.mxu1 %v610_v45 }
 0x12c   :  { %1660 = vmatprep.mubr.bf16.mxu0 %v3002_v28  ;;  %1773 = vmatprep.mubr.bf16.mxu1 %v3004_v29  ;;  %v3916_v28 = vld [vmem:[#allocation11_spill] sm:$0xff]  ;;  %v3917_v29 = vld [vmem:[#allocation12_spill] sm:$0xff] }
 0x12d   :  { %1772 = vmatpush2.bf16.msra.mxu1 %v2777_v15 }
 0x133   :  { %1661 = vmatmul.mubr.bf16.vlgmr.msra.gmra.mxu0 %v3006_v34  ;;  %1774 = vmatmul.mubr.bf16.vlgmr.msra.gmra.mxu1 %v3008_v35  ;;  %v3476_v34 = vld [vmem:[%s3892_s4] sm:$0xf]  ;;  %v3918_v35 = vld [vmem:[#allocation7_spill] sm:$0xff] }
 0x134   :  { %1670 = vmatprep.mubr.bf16.mxu0 %v3020_v0  ;;  %1783 = vmatprep.mubr.bf16.mxu1 %v3035_v19  ;;  %v3480_v0 = vrot.slane %v3476_v34, %v3918_v35  ;;  %v3497_v10 = vrot.slane %v3476_v34, %v3919_v59  ;;  %v3527_v15 = vrot.slane %v2046_v55, %v3918_v35 }
 0x13b   :  { %1671 = vmatmul.mubr.bf16.gmra.mxu0 %v3048_v32  ;;  %1784 = vmatmul.mubr.bf16.gmra.mxu1 %v3054_v52 }
 0x13c   :  { %1680 = vmatprep.mubr.bf16.mxu0 %v3094_v21  ;;  %1793 = vmatprep.mubr.bf16.mxu1 %v3103_v33 }
 0x143   :  { %1681 = vmatmul.mubr.bf16.gmra.mxu0 %v3105_v18  ;;  %1794 = vmatmul.mubr.bf16.gmra.mxu1 %v3121_v17 }
 0x144   :  { %1690 = vmatprep.mubr.bf16.mxu0 %v3168_v31  ;;  %1803 = vmatprep.mubr.bf16.mxu1 %v3177_v7 }
 0x14b   :  { %1691 = vmatmul.mubr.bf16.gmra.mxu0 %v3190_v56  ;;  %1804 = vmatmul.mubr.bf16.gmra.mxu1 %v3200_v61 }
 0x14c   :  { %1700 = vmatprep.mubr.bf16.mxu0 %v3254_v46  ;;  %1813 = vmatprep.mubr.bf16.mxu1 %v3256_v60 }
 0x153   :  { %1701 = vmatmul.mubr.bf16.gmra.mxu0 %v3916_v28  ;;  %1814 = vmatmul.mubr.bf16.gmra.mxu1 %v3917_v29  ;;  %v3530_v28 = vrot.slane %v2046_v55, %v3919_v59 }
 0x154   :  { %1710 = vmatprep.mubr.bf16.mxu0 %v3342_v51  ;;  %1823 = vmatprep.mubr.bf16.mxu1 %v3344_v42 }
 0x15b   :  { %1711 = vmatmul.mubr.bf16.gmra.mxu0 %v3364_v2  ;;  %1824 = vmatmul.mubr.bf16.gmra.mxu1 %v3366_v50 }
 0x15c   :  { %1720 = vmatprep.mubr.bf16.mxu0 %v3395_v4  ;;  %1833 = vmatprep.mubr.bf16.mxu1 %v3406_v13 }
 0x163   :  { %1721 = vmatmul.mubr.bf16.gmra.mxu0 %v3419_v53  ;;  %1834 = vmatmul.mubr.bf16.gmra.mxu1 %v3421_v9 }
 0x164   :  { %1730 = vmatprep.mubr.bf16.mxu0 %v609_v27  ;;  %1843 = vmatprep.mubr.bf16.mxu1 %v611_v23 }
 0x16b   :  { %1731 = vmatmul.mubr.bf16.gmra.mxu0 %v608_v43  ;;  %1844 = vmatmul.mubr.bf16.gmra.mxu1 %v610_v45 }
 0x1aa   :  { %v1436_v19 = vpop.f32.mrf.mxu0  ;;  %v1549_v32 = vpop.f32.mrf.mxu1 }
 0x1ab   :  { %v1437_v52 = vadd.f32 %v1436_v19, %v3480_v0 }
 0x1ac   :  { %v1438_v21 = vpop.f32.mrf.mxu0  ;;  %v1551_v33 = vpop.f32.mrf.mxu1 }
 0x1ad   :  { %v1550_v18 = vadd.f32 %v1549_v32, %v1437_v52  ;;  %v1439_v9 = vadd.f32 %v1438_v21, %v3497_v10  ;;  %v3920_v32 = vld [vmem:[#allocation8_spill] sm:$0xff] }
 0x1ae   :  { %v1440_v17 = vpop.f32.mrf.mxu0  ;;  %v1553_v31 = vpop.f32.mrf.mxu1  ;;  %v3535_v52 = vrot.slane %v3476_v34, %v3920_v32 }
 0x1af   :  { %v1441_v7 = vadd.f32 %v1440_v17, %v3480_v0  ;;  %v1552_v6 = vadd.f32 %v1551_v33, %v1439_v9  ;;  %v1918_v22 = vmul.f32 0.2, %v1550_v18  ;;  %vm1854_vm1 = vcmp.gt.f32.partialorder %v1550_v18, 0.0 }
 0x1b0   :  { %v1442_v56 = vpop.f32.mrf.mxu0  ;;  %v1555_v46 = vpop.f32.mrf.mxu1 }
 0x1b1   :  { %v3484_v61 = vadd.f32 %v1553_v31, %v1441_v7  ;;  %v1443_v27 = vadd.f32 %v1442_v56, %v3497_v10  ;;  %v1919_v25 = vmul.f32 0.2, %v1552_v6  ;;  %vm1855_vm2 = vcmp.gt.f32.partialorder %v1552_v6, 0.0  ;;  %v3921_v7 = vld [vmem:[#allocation10_spill] sm:$0xff] }
 0x1b2   :  { %v1982_v21 = vsel %vm1854_vm1, %v1550_v18, %v1918_v22  ;;  %v3541_v56 = vrot.slane %v3476_v34, %v3921_v7 }
 0x1b3   :  { %v1556_v8 = vadd.f32 %v1555_v46, %v1443_v27  ;;  %v1983_v33 = vsel %vm1855_vm2, %v1552_v6, %v1919_v25  ;;  %vm1858_vm3 = vcmp.gt.f32.partialorder %v3484_v61, 0.0  ;;  %v1922_v35 = vmul.f32 0.2, %v3484_v61 }
 0x1b4   :  { %v1446_v60 = vpop.f32.mrf.mxu0 }
 0x1b5   :  { %v1447_v51 = vadd.f32 %v1446_v60, %v3480_v0  ;;  %v1559_v42 = vpop.f32.mrf.mxu1  ;;  %v1923_v46 = vmul.f32 0.2, %v1556_v8  ;;  %vm1859_vm4 = vcmp.gt.f32.partialorder %v1556_v8, 0.0 }
 0x1b6   :  { %v1448_v2 = vpop.f32.mrf.mxu0 }
 0x1b7   :  { %v3487_v50 = vadd.f32 %v1559_v42, %v1447_v51  ;;  %v1561_v57 = vpop.f32.mrf.mxu1  ;;  %v1449_v11 = vadd.f32 %v1448_v2, %v3497_v10 }
 0x1b8   :  { %v1450_v54 = vpop.f32.mrf.mxu0 }
 0x1b9   :  { %v1563_v12 = vpop.f32.mrf.mxu1  ;;  %v1451_v1 = vadd.f32 %v1450_v54, %v3480_v0  ;;  %v1562_v38 = vadd.f32 %v1561_v57, %v1449_v11  ;;  %v1926_v54 = vmul.f32 0.2, %v3487_v50  ;;  %vm1862_vm6 = vcmp.gt.f32.partialorder %v3487_v50, 0.0 }
 0x1ba   :  { %v1452_v3 = vpop.f32.mrf.mxu0 }
 0x1bb   :  { %v1565_v4 = vpop.f32.mrf.mxu1  ;;  %v3490_v30 = vadd.f32 %v1563_v12, %v1451_v1  ;;  %v1453_v24 = vadd.f32 %v1452_v3, %v3497_v10  ;;  %v1927_v42 = vmul.f32 0.2, %v1562_v38  ;;  %vm1863_vm5 = vcmp.gt.f32.partialorder %v1562_v38, 0.0 }
 0x1bc   :  { %v1456_v47 = vpop.f32.mrf.mxu0  ;;  %v3556_v12 = vrot.slane %v2046_v55, %v3920_v32  ;;  %v3559_v1 = vrot.slane %v2046_v55, %v3921_v7 }
 0x1bd   :  { %v1457_v48 = vadd.f32 %v1456_v47, %v3480_v0  ;;  %v1569_v41 = vpop.f32.mrf.mxu1  ;;  %v1566_v17 = vadd.f32 %v1565_v4, %v1453_v24  ;;  %v1991_v59 = vsel %vm1863_vm5, %v1562_v38, %v1927_v42  ;;  %v1930_v9 = vmul.f32 0.2, %v3490_v30 }
 0x1be   :  { %v1458_v58 = vpop.f32.mrf.mxu0  ;;  %vm1866_vm8 = vcmp.gt.f32.partialorder %v3490_v30, 0.0  ;;  %v2077_v55 = vmul.f32 %v3530_v28, %v1991_v59 }
 0x1bf   :  { %v3493_v26 = vadd.f32 %v1569_v41, %v1457_v48  ;;  %v1571_v13 = vpop.f32.mrf.mxu1  ;;  %v1459_v43 = vadd.f32 %v1458_v58, %v3497_v10  ;;  %v1931_v3 = vmul.f32 0.2, %v1566_v17  ;;  %v2068_v48 = vmul.f32 %v3527_v15, %v1982_v21 }
 0x1c0   :  { %v1460_v20 = vpop.f32.mrf.mxu0  ;;  %v1986_v41 = vsel %vm1858_vm3, %v3484_v61, %v1922_v35  ;;  %v1987_v58 = vsel %vm1859_vm4, %v1556_v8, %v1923_v46  ;;  %vm1867_vm7 = vcmp.gt.f32.partialorder %v1566_v17, 0.0  ;;  %v1994_v24 = vsel %vm1866_vm8, %v3490_v30, %v1930_v9 }
 0x1c1   :  { %v3499_v16 = vpop.f32.mrf.mxu1  ;;  %v1572_v18 = vadd.f32 %v1571_v13, %v1459_v43  ;;  %v1461_v2 = vadd.f32 %v1460_v20, %v3480_v0  ;;  %v2069_v20 = vmul.f32 %v3530_v28, %v1983_v33  ;;  %v1995_v61 = vsel %vm1867_vm7, %v1566_v17, %v1931_v3 }
 0x1c2   :  { %v1462_v63 = vpop.f32.mrf.mxu0  ;;  %vm1870_vm10 = vcmp.gt.f32.partialorder %v3493_v26, 0.0  ;;  %v2072_v25 = vmul.f32 %v3527_v15, %v1986_v41  ;;  %v2080_v35 = vmul.f32 %v3527_v15, %v1994_v24 }
 0x1c3   :  { %v3501_v53 = vpop.f32.mrf.mxu1  ;;  %v1463_v4 = vadd.f32 %v1462_v63, %v3497_v10  ;;  %v1574_v63 = vadd.f32 %v3499_v16, %v1461_v2  ;;  %vm1871_vm9 = vcmp.gt.f32.partialorder %v1572_v18, 0.0  ;;  %v2073_v16 = vmul.f32 %v3530_v28, %v1987_v58 }
 0x1c5   :  { %v1576_v6 = vadd.f32 %v3501_v53, %v1463_v4  ;;  %v1938_v38 = vmul.f32 0.2, %v1574_v63  ;;  %vm1874_vm11 = vcmp.gt.f32.partialorder %v1574_v63, 0.0 }
 0x1c6   :  { %v1466_v40 = vpop.f32.mrf.mxu0 }
 0x1c7   :  { %v1467_v36 = vadd.f32 %v1466_v40, %v3480_v0  ;;  %v1579_v5 = vpop.f32.mrf.mxu1  ;;  %v1935_v40 = vmul.f32 0.2, %v1572_v18  ;;  %v1939_v32 = vmul.f32 0.2, %v1576_v6  ;;  %vm1875_vm12 = vcmp.gt.f32.partialorder %v1576_v6, 0.0 }
 0x1c8   :  { %v3505_v14 = vpop.f32.mrf.mxu0  ;;  %v2002_v42 = vsel %vm1874_vm11, %v1574_v63, %v1938_v38 }
 0x1c9   :  { %v3507_v37 = vadd.f32 %v1579_v5, %v1467_v36  ;;  %v3509_v49 = vpop.f32.mrf.mxu1  ;;  %v1990_v36 = vsel %vm1862_vm6, %v3487_v50, %v1926_v54  ;;  %v1934_v5 = vmul.f32 0.2, %v3493_v26  ;;  %v1469_v27 = vadd.f32 %v3505_v14, %v3497_v10 }
 0x1ca   :  { %v3512_v23 = vpop.f32.mrf.mxu0  ;;  %v3582_v50 = vadd.f32 %v2069_v20, %v2068_v48  ;;  %v1999_v8 = vsel %vm1871_vm9, %v1572_v18, %v1935_v40  ;;  %v2081_v14 = vmul.f32 %v3530_v28, %v1995_v61  ;;  %v2003_v58 = vsel %vm1875_vm12, %v1576_v6, %v1939_v32 }
 0x1cb   :  { %v3515_v39 = vpop.f32.mrf.mxu1  ;;  %v1582_v21 = vadd.f32 %v3509_v49, %v1469_v27  ;;  %v1471_v30 = vadd.f32 %v3512_v23, %v3480_v0  ;;  %v2085_v46 = vmul.f32 %v3530_v28, %v1999_v8  ;;  %v3605_v23 = vadd.f32 %v2073_v16, %v2072_v25 }
 0x1cc   :  { %v3517_v44 = vpop.f32.mrf.mxu0  ;;  %v1942_v4 = vmul.f32 0.2, %v3507_v37  ;;  %v3612_v41 = vadd.f32 %v2081_v14, %v2080_v35  ;;  %vm1878_vm13 = vcmp.gt.f32.partialorder %v3507_v37, 0.0  ;;  %v2088_v20 = vmul.f32 %v3527_v15, %v2002_v42 }
 0x1cd   :  { %v3523_v62 = vpop.f32.mrf.mxu1  ;;  %vm1879_vm14 = vcmp.gt.f32.partialorder %v1582_v21, 0.0 }
 0x1ce   :  { %v2006_v6 = vsel %vm1878_vm13, %v3507_v37, %v1942_v4 }
 0x1cf   :  { %v1476_v45 = vpop.f32.mrf.mxu0 }
 0x1d0   :  { %v1477_v29 = vadd.f32 %v1476_v45, %v3480_v0  ;;  %v1589_v19 = vpop.f32.mrf.mxu1 }
 0x1d1   :  { %v3537_v31 = vpop.f32.mrf.mxu0 }
 0x1d2   :  { %v3545_v60 = vadd.f32 %v1589_v19, %v1477_v29  ;;  %v3547_v51 = vpop.f32.mrf.mxu1  ;;  %v1998_v29 = vsel %vm1870_vm10, %v3493_v26, %v1934_v5  ;;  %v2076_v19 = vmul.f32 %v3527_v15, %v1990_v36  ;;  %v1473_v26 = vadd.f32 %v3517_v44, %v3497_v10 }
 0x1d3   :  { %v3550_v57 = vpop.f32.mrf.mxu0  ;;  %v1479_v49 = vadd.f32 %v3537_v31, %v3497_v10  ;;  %v2084_v3 = vmul.f32 %v3527_v15, %v1998_v29  ;;  %v1943_v44 = vmul.f32 0.2, %v1582_v21  ;;  %v1584_v31 = vadd.f32 %v3515_v39, %v1471_v30 }
 0x1d4   :  { %v3553_v34 = vpop.f32.mrf.mxu1  ;;  %v3607_v54 = vadd.f32 %v2077_v55, %v2076_v19  ;;  %v1586_v59 = vadd.f32 %v3523_v62, %v1473_v26  ;;  %v2089_v39 = vmul.f32 %v3530_v28, %v2003_v58  ;;  %v1950_v55 = vmul.f32 0.2, %v3545_v60 }
 0x1d5   :  { %v1482_v47 = vpop.f32.mrf.mxu0  ;;  %v3618_v63 = vadd.f32 %v2085_v46, %v2084_v3  ;;  %v1592_v36 = vadd.f32 %v3547_v51, %v1479_v49  ;;  %v2007_v25 = vsel %vm1879_vm14, %v1582_v21, %v1943_v44  ;;  %vm1882_vm15 = vcmp.gt.f32.partialorder %v1584_v31, 0.0 }
 0x1d6   :  { %v3568_v13 = vpop.f32.mrf.mxu1  ;;  %v1483_v48 = vadd.f32 %v1482_v47, %v3497_v10  ;;  %v1481_v47 = vadd.f32 %v3550_v57, %v3480_v0  ;;  %v1946_v51 = vmul.f32 0.2, %v1584_v31  ;;  %vm1883_vm0 = vcmp.gt.f32.partialorder %v1586_v59, 0.0 }
 0x1d7   :  { %v1947_v57 = vmul.f32 0.2, %v1586_v59  ;;  %vm1886_vm1 = vcmp.gt.f32.partialorder %v3545_v60, 0.0  ;;  %v1951_v37 = vmul.f32 0.2, %v1592_v36  ;;  %vm1887_vm2 = vcmp.gt.f32.partialorder %v1592_v36, 0.0 }
 0x1d8   :  { %v1596_v27 = vadd.f32 %v3568_v13, %v1483_v48  ;;  %v1594_v13 = vadd.f32 %v3553_v34, %v1481_v47  ;;  %v3637_v32 = vadd.f32 %v2089_v39, %v2088_v20  ;;  %v2092_v21 = vmul.f32 %v3527_v15, %v2006_v6 }
 0x1d9   :  { %v2093_v30 = vmul.f32 %v3530_v28, %v2007_v25  ;;  %v2010_v35 = vsel %vm1882_vm15, %v1584_v31, %v1946_v51  ;;  %v2011_v34 = vsel %vm1883_vm0, %v1586_v59, %v1947_v57  ;;  %v2015_v49 = vsel %vm1887_vm2, %v1592_v36, %v1951_v37 }
 0x1da   :  { %v1486_v11 = vpop.f32.mrf.mxu0  ;;  %v1599_v22 = vpop.f32.mrf.mxu1  ;;  %vm1891_vm3 = vcmp.gt.f32.partialorder %v1596_v27, 0.0  ;;  %vm1890_vm4 = vcmp.gt.f32.partialorder %v1594_v13, 0.0  ;;  %v2096_v31 = vmul.f32 %v3527_v15, %v2010_v35  ;;  %v2097_v20 = vmul.f32 %v3530_v28, %v2011_v34 }
 0x1db   :  { %v1487_v43 = vadd.f32 %v1486_v11, %v3480_v0  ;;  %v2101_v47 = vmul.f32 %v3530_v28, %v2015_v49 }
 0x1dc   :  { %v1488_v53 = vpop.f32.mrf.mxu0  ;;  %v1601_v45 = vpop.f32.mrf.mxu1 }
 0x1dd   :  { %v3595_v33 = vadd.f32 %v1599_v22, %v1487_v43  ;;  %v1489_v5 = vadd.f32 %v1488_v53, %v3497_v10  ;;  %v1955_v53 = vmul.f32 0.2, %v1596_v27 }
 0x1de   :  { %v1490_v17 = vpop.f32.mrf.mxu0  ;;  %v3597_v7 = vpop.f32.mrf.mxu1 }
 0x1df   :  { %v1491_v24 = vadd.f32 %v1490_v17, %v3480_v0  ;;  %v1602_v43 = vadd.f32 %v1601_v45, %v1489_v5  ;;  %v2014_v45 = vsel %vm1886_vm1, %v3545_v60, %v1950_v55  ;;  %v2019_v3 = vsel %vm1891_vm3, %v1596_v27, %v1955_v53 }
 0x1e0   :  { %v1492_v18 = vpop.f32.mrf.mxu0  ;;  %v1605_v2 = vpop.f32.mrf.mxu1  ;;  %v1958_v4 = vmul.f32 0.2, %v3595_v33  ;;  %vm1894_vm6 = vcmp.gt.f32.partialorder %v3595_v33, 0.0  ;;  %v2100_v59 = vmul.f32 %v3527_v15, %v2014_v45  ;;  %v2105_v39 = vmul.f32 %v3530_v28, %v2019_v3 }
 0x1e1   :  { %v1493_v62 = vadd.f32 %v1492_v18, %v3497_v10  ;;  %v1604_v46 = vadd.f32 %v3597_v7, %v1491_v24  ;;  %v1954_v18 = vmul.f32 0.2, %v1594_v13  ;;  %vm1895_vm5 = vcmp.gt.f32.partialorder %v1602_v43, 0.0 }
 0x1e2   :  { %v1496_v9 = vpop.f32.mrf.mxu0  ;;  %v2022_v6 = vsel %vm1894_vm6, %v3595_v33, %v1958_v4  ;;  %v3684_v53 = vadd.f32 %v2097_v20, %v2096_v31 }
 0x1e3   :  { %v1609_v40 = vpop.f32.mrf.mxu1  ;;  %v1497_v61 = vadd.f32 %v1496_v9, %v3480_v0  ;;  %v1606_v14 = vadd.f32 %v1605_v2, %v1493_v62  ;;  %v1959_v2 = vmul.f32 0.2, %v1602_v43  ;;  %v1962_v9 = vmul.f32 0.2, %v1604_v46 }
 0x1e4   :  { %v1498_v11 = vpop.f32.mrf.mxu0  ;;  %v2018_v5 = vsel %vm1890_vm4, %v1594_v13, %v1954_v18  ;;  %vm1898_vm8 = vcmp.gt.f32.partialorder %v1604_v46, 0.0 }
 0x1e5   :  { %v1611_v22 = vpop.f32.mrf.mxu1  ;;  %v3629_v16 = vadd.f32 %v1609_v40, %v1497_v61  ;;  %v1499_v17 = vadd.f32 %v1498_v11, %v3497_v10  ;;  %v1963_v48 = vmul.f32 0.2, %v1606_v14  ;;  %vm1899_vm7 = vcmp.gt.f32.partialorder %v1606_v14, 0.0 }
 0x1e6   :  { %v1500_v8 = vpop.f32.mrf.mxu0  ;;  %v2023_v61 = vsel %vm1895_vm5, %v1602_v43, %v1959_v2  ;;  %v2104_v55 = vmul.f32 %v3527_v15, %v2018_v5  ;;  %v3682_v43 = vadd.f32 %v2093_v30, %v2092_v21 }
 0x1e7   :  { %v1613_v38 = vpop.f32.mrf.mxu1  ;;  %v1612_v60 = vadd.f32 %v1611_v22, %v1499_v17  ;;  %v1501_v7 = vadd.f32 %v1500_v8, %v3480_v0  ;;  %v2027_v27 = vsel %vm1899_vm7, %v1606_v14, %v1963_v48  ;;  %v1966_v62 = vmul.f32 0.2, %v3629_v16 }
 0x1e8   :  { %v1502_v29 = vpop.f32.mrf.mxu0  ;;  %vm1902_vm9 = vcmp.gt.f32.partialorder %v3629_v16, 0.0  ;;  %v2109_v24 = vmul.f32 %v3530_v28, %v2023_v61  ;;  %v2026_v8 = vsel %vm1898_vm8, %v1604_v46, %v1962_v9  ;;  %v2113_v13 = vmul.f32 %v3530_v28, %v2027_v27 }
 0x1e9   :  { %v3635_v19 = vpop.f32.mrf.mxu1  ;;  %v1967_v25 = vmul.f32 0.2, %v1612_v60  ;;  %v1614_v51 = vadd.f32 %v1613_v38, %v1501_v7  ;;  %v1503_v57 = vadd.f32 %v1502_v29, %v3497_v10  ;;  %vm1903_vm10 = vcmp.gt.f32.partialorder %v1612_v60, 0.0 }
 0x1ea   :  { %v3686_v14 = vadd.f32 %v2101_v47, %v2100_v59  ;;  %v2108_v38 = vmul.f32 %v3527_v15, %v2022_v6  ;;  %v2030_v29 = vsel %vm1902_vm9, %v3629_v16, %v1966_v62  ;;  %v3691_v45 = vadd.f32 %v2105_v39, %v2104_v55 }
 0x1eb   :  { %v3648_v26 = vpop.f32.mrf.mxu0  ;;  %v3650_v42 = vpop.f32.mrf.mxu1  ;;  %v2112_v46 = vmul.f32 %v3527_v15, %v2026_v8  ;;  %v2031_v49 = vsel %vm1903_vm10, %v1612_v60, %v1967_v25  ;;  %v1970_v18 = vmul.f32 0.2, %v1614_v51  ;;  %v3695_v21 = vadd.f32 %v3635_v19, %v1503_v57 }
 0x1ec   :  { %vm1906_vm11 = vcmp.gt.f32.partialorder %v1614_v51, 0.0  ;;  %v3698_v16 = vadd.f32 %v2109_v24, %v2108_v38  ;;  %v3701_v48 = vmul.f32 %v3527_v15, %v2030_v29  ;;  %v1507_v7 = vadd.f32 %v3648_v26, %v3480_v0 }
 0x1ed   :  { %v3654_v58 = vpop.f32.mrf.mxu0  ;;  %v3656_v44 = vpop.f32.mrf.mxu1  ;;  %v3706_v31 = vadd.f32 %v2113_v13, %v2112_v46  ;;  %v3709_v19 = vmul.f32 %v3530_v28, %v2031_v49  ;;  %v2034_v5 = vsel %vm1906_vm11, %v1614_v51, %v1970_v18  ;;  %vm1907_vm13 = vcmp.gt.f32.partialorder %v3695_v21, 0.0 }
 0x1ee   :  { %v1971_v26 = vmul.f32 0.2, %v3695_v21  ;;  %v3717_v8 = vmul.f32 %v3527_v15, %v2034_v5  ;;  %v3720_v51 = vadd.f32 %v3650_v42, %v1507_v7  ;;  %v3732_v5 = vadd.f32 %v3654_v58, %v3497_v10 }
 0x1ef   :  { %v3663_v40 = vpop.f32.mrf.mxu0  ;;  %v3665_v36 = vpop.f32.mrf.mxu1 }
 0x1f0   :  { %v2035_v58 = vsel %vm1907_vm13, %v3695_v21, %v1971_v26  ;;  %vm1910_vm8 = vcmp.gt.f32.partialorder %v3720_v51, 0.0 }
 0x1f1   :  { %v3673_v11 = vpop.f32.mrf.mxu0  ;;  %v3675_v22 = vpop.f32.mrf.mxu1 }
 0x1f3   :  { %v1662_v33 = vpop.f32.mrf.mxu0  ;;  %v1775_v37 = vpop.f32.mrf.mxu1 }
 0x1f4   :  { %v1663_v17 = vadd.f32 %v1662_v33, %v3535_v52 }
 0x1f5   :  { %v1664_v35 = vpop.f32.mrf.mxu0  ;;  %v1777_v34 = vpop.f32.mrf.mxu1 }
 0x1f6   :  { %v1776_v30 = vadd.f32 %v1775_v37, %v1663_v17  ;;  %v1665_v2 = vadd.f32 %v1664_v35, %v3541_v56 }
 0x1f7   :  { %v1666_v3 = vpop.f32.mrf.mxu0  ;;  %v1779_v4 = vpop.f32.mrf.mxu1 }
 0x1f8   :  { %v1667_v60 = vadd.f32 %v1666_v3, %v3535_v52  ;;  %vm1856_vm12 = vcmp.gt.f32.partialorder %v1776_v30, 0.0  ;;  %v1920_v20 = vmul.f32 0.2, %v1776_v30  ;;  %v1778_v59 = vadd.f32 %v1777_v34, %v1665_v2 }
 0x1f9   :  { %v1668_v9 = vpop.f32.mrf.mxu0  ;;  %v1781_v47 = vpop.f32.mrf.mxu1 }
 0x1fa   :  { %v1780_v61 = vadd.f32 %v1779_v4, %v1667_v60  ;;  %v1669_v39 = vadd.f32 %v1668_v9, %v3541_v56  ;;  %vm1857_vm14 = vcmp.gt.f32.partialorder %v1778_v59, 0.0  ;;  %v1921_v6 = vmul.f32 0.2, %v1778_v59 }
 0x1fb   :  { %v1672_v27 = vpop.f32.mrf.mxu0  ;;  %v1785_v62 = vpop.f32.mrf.mxu1  ;;  %v1984_v25 = vsel %vm1856_vm12, %v1776_v30, %v1920_v20 }
 0x1fc   :  { %vm1860_vm15 = vcmp.gt.f32.partialorder %v1780_v61, 0.0  ;;  %v1924_v57 = vmul.f32 0.2, %v1780_v61  ;;  %v1782_v55 = vadd.f32 %v1781_v47, %v1669_v39  ;;  %v1673_v24 = vadd.f32 %v1672_v27, %v3535_v52 }
 0x1fd   :  { %v1674_v33 = vpop.f32.mrf.mxu0  ;;  %v1787_v37 = vpop.f32.mrf.mxu1  ;;  %v1985_v13 = vsel %vm1857_vm14, %v1778_v59, %v1921_v6  ;;  %v2070_v38 = vmul.f32 %v3556_v12, %v1984_v25 }
 0x1fe   :  { %v1988_v29 = vsel %vm1860_vm15, %v1780_v61, %v1924_v57  ;;  %vm1861_vm0 = vcmp.gt.f32.partialorder %v1782_v55, 0.0  ;;  %v1925_v17 = vmul.f32 0.2, %v1782_v55  ;;  %v1786_v35 = vadd.f32 %v1785_v62, %v1673_v24 }
 0x1ff   :  { %v1675_v34 = vadd.f32 %v1674_v33, %v3541_v56  ;;  %v1676_v46 = vpop.f32.mrf.mxu0  ;;  %v1789_v49 = vpop.f32.mrf.mxu1  ;;  %v2071_v18 = vmul.f32 %v3559_v1, %v1985_v13  ;;  %v2133_v30 = vadd.f32 %v3582_v50, %v2070_v38  ;;  %v2074_v42 = vmul.f32 %v3556_v12, %v1988_v29 }
 0x200   :  { %vm1864_vm1 = vcmp.gt.f32.partialorder %v1786_v35, 0.0  ;;  %v1928_v2 = vmul.f32 0.2, %v1786_v35  ;;  %v1677_v3 = vadd.f32 %v1676_v46, %v3535_v52  ;;  %v1989_v4 = vsel %vm1861_vm0, %v1782_v55, %v1925_v17 }
 0x201   :  { %v1788_v7 = vadd.f32 %v1787_v37, %v1675_v34  ;;  %v1678_v60 = vpop.f32.mrf.mxu0  ;;  %v1791_v20 = vpop.f32.mrf.mxu1  ;;  %v2134_v59 = vadd.f32 %v2133_v30, %v2071_v18  ;;  %v2075_v9 = vmul.f32 %v3559_v1, %v1989_v4  ;;  %v2138_v47 = vadd.f32 %v3605_v23, %v2074_v42 }
 0x202   :  { %v1790_v50 = vadd.f32 %v1789_v49, %v1677_v3  ;;  %v1679_v61 = vadd.f32 %v1678_v60, %v3541_v56  ;;  %v1992_v39 = vsel %vm1864_vm1, %v1786_v35, %v1928_v2  ;;  %v3742_v33 = vadd.f32 %v3663_v40, %v3480_v0 }
 0x203   :  { %vm1865_vm2 = vcmp.gt.f32.partialorder %v1788_v7, 0.0  ;;  %v1929_v6 = vmul.f32 0.2, %v1788_v7  ;;  %2135 = vadd.xlane.f32.xlu0 %v2134_v59  ;;  %v1682_v27 = vpop.f32.mrf.mxu0  ;;  %v1795_v62 = vpop.f32.mrf.mxu1  ;;  %v2139_v25 = vadd.f32 %v2138_v47, %v2075_v9  ;;  %v2078_v57 = vmul.f32 %v3556_v12, %v1992_v39 }
 0x204   :  { %vm1868_vm3 = vcmp.gt.f32.partialorder %v1790_v50, 0.0  ;;  %v1932_v55 = vmul.f32 0.2, %v1790_v50  ;;  %v1792_v24 = vadd.f32 %v1791_v20, %v1679_v61  ;;  %v1683_v23 = vadd.f32 %v1682_v27, %v3535_v52 }
 0x205   :  { %v1684_v37 = vpop.f32.mrf.mxu0  ;;  %v1797_v13 = vpop.f32.mrf.mxu1  ;;  %v1993_v38 = vsel %vm1865_vm2, %v1788_v7, %v1929_v6  ;;  %v2143_v29 = vadd.f32 %v3607_v54, %v2078_v57  ;;  %v3750_v0 = vadd.f32 %v3709_v19, %v3701_v48  ;;  %v3756_v20 = vmul.f32 %v3530_v28, %v2035_v58 }
 0x206   :  { %v1996_v17 = vsel %vm1868_vm3, %v1790_v50, %v1932_v55  ;;  %vm1869_vm4 = vcmp.gt.f32.partialorder %v1792_v24, 0.0  ;;  %v1933_v35 = vmul.f32 0.2, %v1792_v24  ;;  %v1796_v34 = vadd.f32 %v1795_v62, %v1683_v23 }
 0x207   :  { %v1685_v46 = vadd.f32 %v1684_v37, %v3541_v56  ;;  %2140 = vadd.xlane.f32.xlu0 %v2139_v25  ;;  %v1686_v49 = vpop.f32.mrf.mxu0  ;;  %v1799_v18 = vpop.f32.mrf.mxu1  ;;  %v2079_v21 = vmul.f32 %v3559_v1, %v1993_v38  ;;  %v2082_v26 = vmul.f32 %v3556_v12, %v1996_v17  ;;  %v1974_v62 = vmul.f32 0.2, %v3720_v51 }
 0x208   :  { %vm1872_vm5 = vcmp.gt.f32.partialorder %v1796_v34, 0.0  ;;  %v1936_v40 = vmul.f32 0.2, %v1796_v34  ;;  %v1687_v54 = vadd.f32 %v1686_v49, %v3535_v52  ;;  %v1997_v30 = vsel %vm1869_vm4, %v1792_v24, %v1933_v35 }
 0x209   :  { %v1798_v42 = vadd.f32 %v1797_v13, %v1685_v46  ;;  %v1688_v2 = vpop.f32.mrf.mxu0  ;;  %v1801_v3 = vpop.f32.mrf.mxu1  ;;  %v2144_v4 = vadd.f32 %v2143_v29, %v2079_v21  ;;  %v2083_v7 = vmul.f32 %v3559_v1, %v1997_v30  ;;  %v2148_v60 = vadd.f32 %v3612_v41, %v2082_v26 }
 0x20a   :  { %v2000_v59 = vsel %vm1872_vm5, %v1796_v34, %v1936_v40  ;;  %v1800_v9 = vadd.f32 %v1799_v18, %v1687_v54  ;;  %v1689_v48 = vadd.f32 %v1688_v2, %v3541_v56  ;;  %v3766_v13 = vadd.f32 %v3656_v44, %v3732_v5 }
 0x20b   :  { %vm1873_vm6 = vcmp.gt.f32.partialorder %v1798_v42, 0.0  ;;  %v1937_v19 = vmul.f32 0.2, %v1798_v42  ;;  %2145 = vadd.xlane.f32.xlu1 %v2144_v4  ;;  %v1692_v47 = vpop.f32.mrf.mxu0  ;;  %v1805_v50 = vpop.f32.mrf.mxu1  ;;  %v2149_v61 = vadd.f32 %v2148_v60, %v2083_v7  ;;  %v2086_v39 = vmul.f32 %v3556_v12, %v2000_v59 }
 0x20c   :  { %vm1876_vm7 = vcmp.gt.f32.partialorder %v1800_v9, 0.0  ;;  %v1940_v6 = vmul.f32 0.2, %v1800_v9  ;;  %v1802_v27 = vadd.f32 %v1801_v3, %v1689_v48  ;;  %v1693_v41 = vadd.f32 %v1692_v47, %v3535_v52 }
 0x20d   :  { %v1694_v25 = vpop.f32.mrf.mxu0  ;;  %v1807_v57 = vpop.f32.mrf.mxu1  ;;  %v2001_v55 = vsel %vm1873_vm6, %v1798_v42, %v1937_v19  ;;  %v2153_v24 = vadd.f32 %v3618_v63, %v2086_v39  ;;  %v3776_v54 = vadd.f32 %v3665_v36, %v3742_v33  ;;  %v2038_v36 = vsel %vm1910_vm8, %v3720_v51, %v1974_v62 }
 0x20e   :  { %v2004_v23 = vsel %vm1876_vm7, %v1800_v9, %v1940_v6  ;;  %vm1877_vm9 = vcmp.gt.f32.partialorder %v1802_v27, 0.0  ;;  %v1941_v58 = vmul.f32 0.2, %v1802_v27  ;;  %v1806_v37 = vadd.f32 %v1805_v50, %v1693_v41 }
 0x20f   :  { %v1695_v38 = vadd.f32 %v1694_v25, %v3541_v56  ;;  %2150 = vadd.xlane.f32.xlu1 %v2149_v61  ;;  %v1696_v29 = vpop.f32.mrf.mxu0  ;;  %v1809_v17 = vpop.f32.mrf.mxu1  ;;  %v2087_v35 = vmul.f32 %v3559_v1, %v2001_v55  ;;  %v2090_v34 = vmul.f32 %v3556_v12, %v2004_v23  ;;  %v1513_v33 = vadd.f32 %v3673_v11, %v3497_v10 }
 0x210   :  { %vm1880_vm10 = vcmp.gt.f32.partialorder %v1806_v37, 0.0  ;;  %v1944_v46 = vmul.f32 0.2, %v1806_v37  ;;  %v1697_v63 = vadd.f32 %v1696_v29, %v3535_v52  ;;  %v2005_v49 = vsel %vm1877_vm9, %v1802_v27, %v1941_v58 }
 0x211   :  { %v1808_v18 = vadd.f32 %v1807_v57, %v1695_v38  ;;  %v1698_v21 = vpop.f32.mrf.mxu0  ;;  %v1811_v26 = vpop.f32.mrf.mxu1  ;;  %v2154_v40 = vadd.f32 %v2153_v24, %v2087_v35  ;;  %v2091_v44 = vmul.f32 %v3559_v1, %v2005_v49  ;;  %v2158_v5 = vadd.f32 %v3637_v32, %v2090_v34 }
 0x212   :  { %v2008_v30 = vsel %vm1880_vm10, %v1806_v37, %v1944_v46  ;;  %v1810_v42 = vadd.f32 %v1809_v17, %v1697_v63  ;;  %v1699_v2 = vadd.f32 %v1698_v21, %v3541_v56  ;;  %vm1911_vm14 = vcmp.gt.f32.partialorder %v3766_v13, 0.0 }
 0x213   :  { %vm1881_vm11 = vcmp.gt.f32.partialorder %v1808_v18, 0.0  ;;  %v1945_v3 = vmul.f32 0.2, %v1808_v18  ;;  %2155 = vadd.xlane.f32.xlu0 %v2154_v40  ;;  %v1702_v4 = vpop.f32.mrf.mxu0  ;;  %v1815_v7 = vpop.f32.mrf.mxu1  ;;  %v2159_v60 = vadd.f32 %v2158_v5, %v2091_v44  ;;  %v2094_v59 = vmul.f32 %v3556_v12, %v2008_v30 }
 0x214   :  { %vm1884_vm12 = vcmp.gt.f32.partialorder %v1810_v42, 0.0  ;;  %v1948_v9 = vmul.f32 0.2, %v1810_v42  ;;  %v1812_v48 = vadd.f32 %v1811_v26, %v1699_v2  ;;  %v1703_v32 = vadd.f32 %v1702_v4, %v3535_v52 }
 0x215   :  { %v1704_v19 = vpop.f32.mrf.mxu0  ;;  %v1817_v47 = vpop.f32.mrf.mxu1  ;;  %2160 = vadd.xlane.f32.xlu1 %v2159_v60  ;;  %v2009_v50 = vsel %vm1881_vm11, %v1808_v18, %v1945_v3  ;;  %v2163_v61 = vadd.f32 %v3682_v43, %v2094_v59  ;;  %v1975_v29 = vmul.f32 0.2, %v3766_v13  ;;  %v3805_v3 = vadd.f32 %v3756_v20, %v3717_v8 }
 0x216   :  { %v2012_v39 = vsel %vm1884_vm12, %v1810_v42, %v1948_v9  ;;  %vm1885_vm13 = vcmp.gt.f32.partialorder %v1812_v48, 0.0  ;;  %v1949_v6 = vmul.f32 0.2, %v1812_v48  ;;  %v1816_v27 = vadd.f32 %v1815_v7, %v1703_v32 }
 0x217   :  { %v1705_v41 = vadd.f32 %v1704_v19, %v3541_v56  ;;  %v1706_v25 = vpop.f32.mrf.mxu0  ;;  %v1819_v51 = vpop.f32.mrf.mxu1  ;;  %v2095_v62 = vmul.f32 %v3559_v1, %v2009_v50  ;;  %v2098_v10 = vmul.f32 %v3556_v12, %v2012_v39  ;;  %v3808_v59 = vadd.f32 %v3675_v22, %v1513_v33 }
 0x218   :  { %vm1888_vm15 = vcmp.gt.f32.partialorder %v1816_v27, 0.0  ;;  %v1952_v11 = vmul.f32 0.2, %v1816_v27  ;;  %v1707_v57 = vadd.f32 %v1706_v25, %v3535_v52  ;;  %v2013_v55 = vsel %vm1885_vm13, %v1812_v48, %v1949_v6 }
 0x219   :  { %v1818_v43 = vadd.f32 %v1817_v47, %v1705_v41  ;;  %v1708_v24 = vpop.f32.mrf.mxu0  ;;  %v1821_v23 = vpop.f32.mrf.mxu1  ;;  %v2164_v58 = vadd.f32 %v2163_v61, %v2095_v62  ;;  %v2099_v37 = vmul.f32 %v3559_v1, %v2013_v55  ;;  %v2168_v38 = vadd.f32 %v3684_v53, %v2098_v10 }
 0x21a   :  { %v2016_v17 = vsel %vm1888_vm15, %v1816_v27, %v1952_v11  ;;  %v1820_v35 = vadd.f32 %v1819_v51, %v1707_v57  ;;  %v1709_v34 = vadd.f32 %v1708_v24, %v3541_v56  ;;  %v3800_v53 = vmul.f32 %v3527_v15, %v2038_v36 }
 0x21b   :  { %vm1889_vm0 = vcmp.gt.f32.partialorder %v1818_v43, 0.0  ;;  %v1953_v46 = vmul.f32 0.2, %v1818_v43  ;;  %2165 = vadd.xlane.f32.xlu0 %v2164_v58  ;;  %v1712_v63 = vpop.f32.mrf.mxu0  ;;  %v1825_v49 = vpop.f32.mrf.mxu1  ;;  %v2169_v18 = vadd.f32 %v2168_v38, %v2099_v37  ;;  %v2102_v21 = vmul.f32 %v3556_v12, %v2016_v17 }
 0x21c   :  { %vm1892_vm1 = vcmp.gt.f32.partialorder %v1820_v35, 0.0  ;;  %v1956_v26 = vmul.f32 0.2, %v1820_v35  ;;  %v1822_v40 = vadd.f32 %v1821_v23, %v1709_v34  ;;  %v1713_v44 = vadd.f32 %v1712_v63, %v3535_v52 }
 0x21d   :  { %v1714_v5 = vpop.f32.mrf.mxu0  ;;  %v1827_v30 = vpop.f32.mrf.mxu1  ;;  %2170 = vadd.xlane.f32.xlu1 %v2169_v18  ;;  %v2017_v42 = vsel %vm1889_vm0, %v1818_v43, %v1953_v46  ;;  %v2173_v2 = vadd.f32 %v3686_v14, %v2102_v21  ;;  %v2039_v6 = vsel %vm1911_vm14, %v3766_v13, %v1975_v29  ;;  %vm1914_vm4 = vcmp.gt.f32.partialorder %v3776_v54, 0.0 }
 0x21e   :  { %v2020_v4 = vsel %vm1892_vm1, %v1820_v35, %v1956_v26  ;;  %vm1893_vm2 = vcmp.gt.f32.partialorder %v1822_v40, 0.0  ;;  %v1957_v7 = vmul.f32 0.2, %v1822_v40  ;;  %v1826_v60 = vadd.f32 %v1825_v49, %v1713_v44 }
 0x21f   :  { %v1715_v9 = vadd.f32 %v1714_v5, %v3541_v56  ;;  %v1716_v48 = vpop.f32.mrf.mxu0  ;;  %v1829_v32 = vpop.f32.mrf.mxu1  ;;  %v2103_v36 = vmul.f32 %v3559_v1, %v2017_v42  ;;  %v2106_v19 = vmul.f32 %v3556_v12, %v2020_v4  ;;  %v2125_v13 = vmul.f32 %v3530_v28, %v2039_v6 }
 0x220   :  { %vm1896_vm3 = vcmp.gt.f32.partialorder %v1826_v60, 0.0  ;;  %v1960_v14 = vmul.f32 0.2, %v1826_v60  ;;  %v1717_v8 = vadd.f32 %v1716_v48, %v3535_v52  ;;  %v2021_v20 = vsel %vm1893_vm2, %v1822_v40, %v1957_v7 }
 0x221   :  { %v1828_v47 = vadd.f32 %v1827_v30, %v1715_v9  ;;  %v1718_v50 = vpop.f32.mrf.mxu0  ;;  %v1831_v61 = vpop.f32.mrf.mxu1  ;;  %v2174_v39 = vadd.f32 %v2173_v2, %v2103_v36  ;;  %v2107_v22 = vmul.f32 %v3559_v1, %v2021_v20  ;;  %v2178_v33 = vadd.f32 %v3691_v45, %v2106_v19 }
 0x222   :  { %v2024_v27 = vsel %vm1896_vm3, %v1826_v60, %v1960_v14  ;;  %v1830_v41 = vadd.f32 %v1829_v32, %v1717_v8  ;;  %v1719_v25 = vadd.f32 %v1718_v50, %v3541_v56  ;;  %v1978_v24 = vmul.f32 0.2, %v3776_v54 }
 0x223   :  { %vm1897_vm5 = vcmp.gt.f32.partialorder %v1828_v47, 0.0  ;;  %v1961_v51 = vmul.f32 0.2, %v1828_v47  ;;  %2175 = vadd.xlane.f32.xlu0 %v2174_v39  ;;  %v1722_v62 = vpop.f32.mrf.mxu0  ;;  %v1835_v10 = vpop.f32.mrf.mxu1  ;;  %v2179_v11 = vadd.f32 %v2178_v33, %v2107_v22  ;;  %v2110_v57 = vmul.f32 %v3556_v12, %v2024_v27 }
 0x224   :  { %vm1900_vm6 = vcmp.gt.f32.partialorder %v1830_v41, 0.0  ;;  %v1964_v45 = vmul.f32 0.2, %v1830_v41  ;;  %v1832_v55 = vadd.f32 %v1831_v61, %v1719_v25  ;;  %v1723_v43 = vadd.f32 %v1722_v62, %v3535_v52 }
 0x225   :  { %v1724_v23 = vpop.f32.mrf.mxu0  ;;  %v1837_v58 = vpop.f32.mrf.mxu1  ;;  %2180 = vadd.xlane.f32.xlu1 %v2179_v11  ;;  %v2025_v37 = vsel %vm1897_vm5, %v1828_v47, %v1961_v51  ;;  %v2183_v38 = vadd.f32 %v3698_v16, %v2110_v57  ;;  %v1979_v34 = vmul.f32 0.2, %v3808_v59  ;;  %vm1915_vm9 = vcmp.gt.f32.partialorder %v3808_v59, 0.0 }
 0x226   :  { %v2028_v29 = vsel %vm1900_vm6, %v1830_v41, %v1964_v45  ;;  %vm1901_vm7 = vcmp.gt.f32.partialorder %v1832_v55, 0.0  ;;  %v1965_v17 = vmul.f32 0.2, %v1832_v55  ;;  %v1836_v35 = vadd.f32 %v1835_v10, %v1723_v43 }
 0x227   :  { %v1725_v46 = vadd.f32 %v1724_v23, %v3541_v56  ;;  %v1726_v63 = vpop.f32.mrf.mxu0  ;;  %v1839_v49 = vpop.f32.mrf.mxu1  ;;  %v2111_v18 = vmul.f32 %v3559_v1, %v2025_v37  ;;  %v2114_v21 = vmul.f32 %v3556_v12, %v2028_v29  ;;  %v2043_v50 = vsel %vm1915_vm9, %v3808_v59, %v1979_v34 }
 0x228   :  { %vm1904_vm8 = vcmp.gt.f32.partialorder %v1836_v35, 0.0  ;;  %v1968_v26 = vmul.f32 0.2, %v1836_v35  ;;  %v1727_v40 = vadd.f32 %v1726_v63, %v3535_v52  ;;  %v2029_v44 = vsel %vm1901_vm7, %v1832_v55, %v1965_v17 }
 0x229   :  { %v1838_v16 = vadd.f32 %v1837_v58, %v1725_v46  ;;  %v1728_v5 = vpop.f32.mrf.mxu0  ;;  %v1841_v30 = vpop.f32.mrf.mxu1  ;;  %v2184_v42 = vadd.f32 %v2183_v38, %v2111_v18  ;;  %v2115_v2 = vmul.f32 %v3559_v1, %v2029_v44  ;;  %v2188_v4 = vadd.f32 %v3706_v31, %v2114_v21 }
 0x22a   :  { %v2032_v7 = vsel %vm1904_vm8, %v1836_v35, %v1968_v26  ;;  %v1840_v60 = vadd.f32 %v1839_v49, %v1727_v40  ;;  %v1729_v9 = vadd.f32 %v1728_v5, %v3541_v56  ;;  %v2042_v31 = vsel %vm1914_vm4, %v3776_v54, %v1978_v24 }
 0x22b   :  { %vm1905_vm10 = vcmp.gt.f32.partialorder %v1838_v16, 0.0  ;;  %v1969_v48 = vmul.f32 0.2, %v1838_v16  ;;  %2185 = vadd.xlane.f32.xlu0 %v2184_v42  ;;  %v1732_v32 = vpop.f32.mrf.mxu0  ;;  %v1845_v36 = vpop.f32.mrf.mxu1  ;;  %v2189_v19 = vadd.f32 %v2188_v4, %v2115_v2  ;;  %v2118_v14 = vmul.f32 %v3556_v12, %v2032_v7 }
 0x22c   :  { %vm1908_vm11 = vcmp.gt.f32.partialorder %v1840_v60, 0.0  ;;  %v1972_v8 = vmul.f32 0.2, %v1840_v60  ;;  %v1842_v20 = vadd.f32 %v1841_v30, %v1729_v9  ;;  %v1733_v47 = vadd.f32 %v1732_v32, %v3535_v52 }
 0x22d   :  { %v1734_v61 = vpop.f32.mrf.mxu0  ;;  %v1847_v39 = vpop.f32.mrf.mxu1  ;;  %2190 = vadd.xlane.f32.xlu1 %v2189_v19  ;;  %v2033_v22 = vsel %vm1905_vm10, %v1838_v16, %v1969_v48  ;;  %v2193_v33 = vadd.f32 %v3750_v0, %v2118_v14  ;;  %v2202_v59 = vadd.f32 %v2125_v13, %v3800_v53  ;;  %v2129_v58 = vmul.f32 %v3530_v28, %v2043_v50 }
 0x22e   :  { %v2036_v6 = vsel %vm1908_vm11, %v1840_v60, %v1972_v8  ;;  %vm1909_vm12 = vcmp.gt.f32.partialorder %v1842_v20, 0.0  ;;  %v1973_v27 = vmul.f32 0.2, %v1842_v20  ;;  %v1846_v41 = vadd.f32 %v1845_v36, %v1733_v47 }
 0x22f   :  { %v1735_v25 = vadd.f32 %v1734_v61, %v3541_v56  ;;  %v1736_v51 = vpop.f32.mrf.mxu0  ;;  %v1849_v62 = vpop.f32.mrf.mxu1  ;;  %v2119_v54 = vmul.f32 %v3559_v1, %v2033_v22  ;;  %v2122_v10 = vmul.f32 %v3556_v12, %v2036_v6  ;;  %v2128_v46 = vmul.f32 %v3527_v15, %v2042_v31  ;;  %v2569_v15 = vld [vmem:[#allocation2] ss:$0 sm:$0xff] }
 0x230   :  { %vm1912_vm13 = vcmp.gt.f32.partialorder %v1846_v41, 0.0  ;;  %v1976_v11 = vmul.f32 0.2, %v1846_v41  ;;  %v1737_v57 = vadd.f32 %v1736_v51, %v3535_v52  ;;  %v2037_v45 = vsel %vm1909_vm12, %v1842_v20, %v1973_v27 }
 0x231   :  { %v1848_v0 = vadd.f32 %v1847_v39, %v1735_v25  ;;  %v1738_v55 = vpop.f32.mrf.mxu0  ;;  %v2194_v43 = vadd.f32 %v2193_v33, %v2119_v54  ;;  %v2123_v24 = vmul.f32 %v3559_v1, %v2037_v45  ;;  %v2198_v23 = vadd.f32 %v3805_v3, %v2122_v10  ;;  %v1851_v13 = vpop.f32.mrf.mxu1 }
 0x232   :  { %v2040_v37 = vsel %vm1912_vm13, %v1846_v41, %v1976_v11  ;;  %v1850_v38 = vadd.f32 %v1849_v62, %v1737_v57  ;;  %v1739_v29 = vadd.f32 %v1738_v55, %v3541_v56  ;;  %v2207_v21 = vadd.f32 %v2129_v58, %v2128_v46 }
 0x233   :  { %vm1913_vm14 = vcmp.gt.f32.partialorder %v1848_v0, 0.0  ;;  %v1977_v53 = vmul.f32 0.2, %v1848_v0  ;;  %2195 = vadd.xlane.f32.xlu0 %v2194_v43  ;;  %v2199_v17 = vadd.f32 %v2198_v23, %v2123_v24  ;;  %v2126_v52 = vmul.f32 %v3556_v12, %v2040_v37 }
 0x234   :  { %vm1916_vm15 = vcmp.gt.f32.partialorder %v1850_v38, 0.0  ;;  %v1980_v35 = vmul.f32 0.2, %v1850_v38  ;;  %v1852_v34 = vadd.f32 %v1851_v13, %v1739_v29  ;;  %v3922_v24 = vlaneseq  ;;  %v3923_v13 = vld [vmem:[#allocation6_spill] sm:$0xff] }
 0x235   :  { %2200 = vadd.xlane.f32.xlu1 %v2199_v17  ;;  %v2041_v3 = vsel %vm1913_vm14, %v1848_v0, %v1977_v53  ;;  %v2203_v63 = vadd.f32 %v2202_v59, %v2126_v52  ;;  %vm2310_vm1 = vcmask 130112   ;;  %vm2317_vm2 = vcmask 195712  }
 0x236   :  { %v2044_v28 = vsel %vm1916_vm15, %v1850_v38, %v1980_v35  ;;  %vm1917_vm0 = vcmp.gt.f32.partialorder %v1852_v34, 0.0  ;;  %v1981_v49 = vmul.f32 0.2, %v1852_v34  ;;  %v2127_v56 = vmul.f32 %v3559_v1, %v2041_v3 }
 0x237   :  { %v2130_v18 = vmul.f32 %v3556_v12, %v2044_v28  ;;  %v2300_v23 = vand.u32 127, %v3922_v24  ;;  %vm2324_vm3 = vcmask 261312   ;;  %vm2331_vm4 = vcmask 326912  }
 0x238   :  { %v2204_v26 = vadd.f32 %v2203_v63, %v2127_v56  ;;  %v2045_v40 = vsel %vm1917_vm0, %v1852_v34, %v1981_v49  ;;  %vm2338_vm5 = vcmask 392512   ;;  %vm2345_vm6 = vcmask 458112  }
 0x239   :  { %v2131_v44 = vmul.f32 %v3559_v1, %v2045_v40  ;;  %v2208_v16 = vadd.f32 %v2207_v21, %v2130_v18  ;;  %v2305_v58 = vadd.s32 4294967288, %v2300_v23  ;;  %v2312_v37 = vadd.s32 4294967280, %v2300_v23 }
 0x23a   :  { %2205 = vadd.xlane.f32.xlu0 %v2204_v26  ;;  %v2319_v38 = vadd.s32 4294967272, %v2300_v23  ;;  %v2326_v53 = vadd.s32 4294967264, %v2300_v23  ;;  %v2333_v52 = vadd.s32 4294967256, %v2300_v23  ;;  %v2340_v46 = vadd.s32 4294967248, %v2300_v23 }
 0x23b   :  { %v2209_v5 = vadd.f32 %v2208_v16, %v2131_v44  ;;  %v2308_v17 = vsub.s32 %v2305_v58, %v3923_v13  ;;  %v2315_v34 = vsub.s32 %v2312_v37, %v3923_v13  ;;  %v2303_v3 = vsub.s32 %v2300_v23, %v3923_v13 }
 0x23c   :  { %v2322_v63 = vsub.s32 %v2319_v38, %v3923_v13  ;;  %v2347_v28 = vadd.s32 4294967240, %v2300_v23  ;;  %v2329_v49 = vsub.s32 %v2326_v53, %v3923_v13  ;;  %v2354_v56 = vadd.s32 4294967232, %v2300_v23 }
 0x23d   :  { %2210 = vadd.xlane.f32.xlu1 %v2209_v5  ;;  %v2336_v21 = vsub.s32 %v2333_v52, %v3923_v13  ;;  %v2361_v40 = vadd.s32 4294967224, %v2300_v23  ;;  %v2343_v16 = vsub.s32 %v2340_v46, %v3923_v13  ;;  %vm2352_vm7 = vcmask 523712  }
 0x23e   :  { %vm2359_vm8 = vcmask 589312   ;;  %vm2366_vm9 = vcmask 654912   ;;  %vm2373_vm10 = vcmask 720512   ;;  %vm2380_vm11 = vcmask 786112  }
 0x23f   :  { %vm2387_vm12 = vcmask 851712   ;;  %vm2394_vm13 = vcmask 917312   ;;  %vm2401_vm14 = vcmask 982912   ;;  %vm2408_vm15 = vcmask 1048512  }
 0x28c   :  { %v2136_v30 = vpop.xlane.xlu0 %2135 }
 0x28d   :  { %v2219_v42 = vadd.f32 %v2569_v15, %v2136_v30 }
 0x28f   :  { %2252 = vperm.xlu0 %2574, %v2219_v42  }
 0x290   :  { %v2141_v2 = vpop.xlane.xlu0 %2140 }
 0x291   :  { %v2220_v4 = vadd.f32 %v2569_v15, %v2141_v2  ;;  %v2350_v2 = vsub.s32 %v2347_v28, %v3923_v13 }
 0x293   :  { %2255 = vperm.xlu1 %2575, %v2220_v4   ;;  %v2375_v4 = vadd.s32 4294967208, %v2300_v23 }
 0x294   :  { %v2146_v7 = vpop.xlane.xlu1 %2145 }
 0x295   :  { %v2221_v60 = vadd.f32 %v2569_v15, %v2146_v7 }
 0x297   :  { %2258 = vperm.xlu1 %2575, %v2221_v60   ;;  %v2357_v60 = vsub.s32 %v2354_v56, %v3923_v13 }
 0x298   :  { %v2151_v12 = vpop.xlane.xlu1 %2150 }
 0x299   :  { %v2222_v9 = vadd.f32 %v2569_v15, %v2151_v12  ;;  %v2382_v12 = vadd.s32 4294967200, %v2300_v23 }
 0x29b   :  { %2261 = vperm.xlu1 %2575, %v2222_v9  }
 0x29c   :  { %v2156_v48 = vpop.xlane.xlu0 %2155 }
 0x29d   :  { %v2223_v32 = vadd.f32 %v2569_v15, %v2156_v48 }
 0x29e   :  { %v2161_v1 = vpop.xlane.xlu1 %2160 }
 0x29f   :  { %2264 = vperm.xlu1 %2575, %v2223_v32   ;;  %v2224_v36 = vadd.f32 %v2569_v15, %v2161_v1  ;;  %v2364_v32 = vsub.s32 %v2361_v40, %v3923_v13 }
 0x2a3   :  { %2267 = vperm.xlu1 %2575, %v2224_v36   ;;  %v2389_v36 = vadd.s32 4294967192, %v2300_v23 }
 0x2a4   :  { %v2166_v19 = vpop.xlane.xlu0 %2165 }
 0x2a5   :  { %v2225_v14 = vadd.f32 %v2569_v15, %v2166_v19 }
 0x2a6   :  { %v2171_v8 = vpop.xlane.xlu1 %2170 }
 0x2a7   :  { %2270 = vperm.xlu1 %2575, %v2225_v14   ;;  %v2226_v20 = vadd.f32 %v2569_v15, %v2171_v8 }
 0x2ab   :  { %2273 = vperm.xlu1 %2575, %v2226_v20  }
 0x2ac   :  { %v2176_v47 = vpop.xlane.xlu0 %2175 }
 0x2ad   :  { %v2227_v31 = vadd.f32 %v2569_v15, %v2176_v47  ;;  %v2396_v47 = vadd.s32 4294967184, %v2300_v23 }
 0x2ae   :  { %v2181_v50 = vpop.xlane.xlu1 %2180 }
 0x2af   :  { %2276 = vperm.xlu1 %2575, %v2227_v31   ;;  %v2228_v61 = vadd.f32 %v2569_v15, %v2181_v50 }
 0x2b1   :  { %2279 = vperm.xlu0 %2574, %v2228_v61   ;;  %v2378_v61 = vsub.s32 %v2375_v4, %v3923_v13 }
 0x2b4   :  { %v2186_v39 = vpop.xlane.xlu0 %2185 }
 0x2b5   :  { %v2229_v22 = vadd.f32 %v2569_v15, %v2186_v39 }
 0x2b6   :  { %v2191_v33 = vpop.xlane.xlu1 %2190 }
 0x2b7   :  { %2282 = vperm.xlu1 %2575, %v2229_v22   ;;  %v2230_v6 = vadd.f32 %v2569_v15, %v2191_v33  ;;  %v2385_v33 = vsub.s32 %v2382_v12, %v3923_v13 }
 0x2b9   :  { %2285 = vperm.xlu0 %2574, %v2230_v6  }
 0x2bc   :  { %v2196_v27 = vpop.xlane.xlu0 %2195 }
 0x2bd   :  { %v2231_v41 = vadd.f32 %v2569_v15, %v2196_v27 }
 0x2be   :  { %v2201_v25 = vpop.xlane.xlu1 %2200 }
 0x2bf   :  { %2288 = vperm.xlu1 %2575, %v2231_v41   ;;  %v2232_v51 = vadd.f32 %v2569_v15, %v2201_v25  ;;  %v2392_v25 = vsub.s32 %v2389_v36, %v3923_v13 }
 0x2c1   :  { %2291 = vperm.xlu0 %2574, %v2232_v51   ;;  %v2403_v51 = vadd.s32 4294967176, %v2300_v23 }
 0x2c3   :  { %v2206_v62 = vpop.xlane.xlu0 %2205 }
 0x2c4   :  { %v2233_v54 = vadd.f32 %v2569_v15, %v2206_v62 }
 0x2c6   :  { %2294 = vperm.xlu1 %2575, %v2233_v54   ;;  %v2211_v10 = vpop.xlane.xlu1 %2210 }
 0x2c7   :  { %v2234_v59 = vadd.f32 %v2569_v15, %v2211_v10  ;;  %v2368_v15 = vadd.s32 4294967216, %v2300_v23  ;;  %v2406_v23 = vsub.s32 %v2403_v51, %v3923_v13 }
 0x2c9   :  { %2297 = vperm.xlu0 %2574, %v2234_v59   ;;  %v2371_v8 = vsub.s32 %v2368_v15, %v3923_v13  ;;  %v2399_v59 = vsub.s32 %v2396_v47, %v3923_v13 }
 0x30a   :  { %v2253_v35 = vpop.permute.xlu0 %2252 }
 0x30b   :  { %v2304_v30 = vrot.slane %v2253_v35, %v2303_v3 }
 0x30e   :  { %v2256_v11 = vpop.permute.xlu1 %2255 }
 0x30f   :  { %v2309_v18 = vrot.slane %v2256_v11, %v2308_v17 }
 0x311   :  { %v2311_v9 = vsel %vm2310_vm1, %v2309_v18, %v2304_v30 }
 0x312   :  { %v2259_v57 = vpop.permute.xlu1 %2258 }
 0x313   :  { %v2316_v44 = vrot.slane %v2259_v57, %v2315_v34 }
 0x315   :  { %v2318_v19 = vsel %vm2317_vm2, %v2316_v44, %v2311_v9 }
 0x316   :  { %v2262_v45 = vpop.permute.xlu1 %2261 }
 0x317   :  { %v2323_v42 = vrot.slane %v2262_v45, %v2322_v63 }
 0x319   :  { %v2325_v31 = vsel %vm2324_vm3, %v2323_v42, %v2318_v19 }
 0x31a   :  { %v2265_v0 = vpop.permute.xlu1 %2264 }
 0x31b   :  { %v2330_v7 = vrot.slane %v2265_v0, %v2329_v49 }
 0x31d   :  { %v2332_v39 = vsel %vm2331_vm4, %v2330_v7, %v2325_v31 }
 0x31e   :  { %v2268_v55 = vpop.permute.xlu1 %2267 }
 0x31f   :  { %v2337_v48 = vrot.slane %v2268_v55, %v2336_v21 }
 0x321   :  { %v2339_v6 = vsel %vm2338_vm5, %v2337_v48, %v2332_v39 }
 0x322   :  { %v2271_v43 = vpop.permute.xlu1 %2270 }
 0x323   :  { %v2344_v14 = vrot.slane %v2271_v43, %v2343_v16 }
 0x325   :  { %v2346_v62 = vsel %vm2345_vm6, %v2344_v14, %v2339_v6 }
 0x326   :  { %v2274_v29 = vpop.permute.xlu1 %2273 }
 0x327   :  { %v2351_v50 = vrot.slane %v2274_v29, %v2350_v2 }
 0x329   :  { %v2353_v11 = vsel %vm2352_vm7, %v2351_v50, %v2346_v62 }
 0x32a   :  { %v2277_v26 = vpop.permute.xlu1 %2276 }
 0x32b   :  { %v2358_v22 = vrot.slane %v2277_v26, %v2357_v60 }
 0x32c   :  { %v2280_v5 = vpop.permute.xlu0 %2279 }
 0x32d   :  { %v2365_v27 = vrot.slane %v2280_v5, %v2364_v32  ;;  %v2360_v45 = vsel %vm2359_vm8, %v2358_v22, %v2353_v11 }
 0x32f   :  { %v2367_v55 = vsel %vm2366_vm9, %v2365_v27, %v2360_v45 }
 0x332   :  { %v2283_v1 = vpop.permute.xlu1 %2282 }
 0x333   :  { %v2372_v54 = vrot.slane %v2283_v1, %v2371_v8 }
 0x334   :  { %v2286_v20 = vpop.permute.xlu0 %2285 }
 0x335   :  { %v2379_v57 = vrot.slane %v2286_v20, %v2378_v61  ;;  %v2374_v58 = vsel %vm2373_vm10, %v2372_v54, %v2367_v55 }
 0x337   :  { %v2381_v38 = vsel %vm2380_vm11, %v2379_v57, %v2374_v58 }
 0x33a   :  { %v2289_v41 = vpop.permute.xlu1 %2288 }
 0x33b   :  { %v2386_v0 = vrot.slane %v2289_v41, %v2385_v33 }
 0x33c   :  { %v2292_v10 = vpop.permute.xlu0 %2291 }
 0x33d   :  { %v2393_v43 = vrot.slane %v2292_v10, %v2392_v25  ;;  %v2388_v29 = vsel %vm2387_vm12, %v2386_v0, %v2381_v38 }
 0x33f   :  { %v2395_v17 = vsel %vm2394_vm13, %v2393_v43, %v2388_v29 }
 0x341   :  { %v2295_v24 = vpop.permute.xlu1 %2294 }
 0x342   :  { %v2400_v37 = vrot.slane %v2295_v24, %v2399_v59 }
 0x344   :  { %v2298_v53 = vpop.permute.xlu0 %2297  ;;  %v2402_v35 = vsel %vm2401_vm14, %v2400_v37, %v2395_v17 }
 0x345   :  { %v2407_v52 = vrot.slane %v2298_v53, %v2406_v23 }
 0x347   :  { %v2409_v34 = vsel %vm2408_vm15, %v2407_v52, %v2402_v35 }
 0x348   :  { %2411 = vst [vmem:[%s3895_s7] sm:$0x1] %v2409_v34 }
 0x349   :  { %2416 = vsyncpa [#allocation4], 1 }

</bundles_post_ra>
